<compile_context>
chip_gen: v6e
topology: v6e:2x2x1
jax: 0.10.0
libtpu: 0.0.40
codegen_flags: <defaults>
</compile_context>

<pallas_src>
import jax
import jax.numpy as jnp
from jax import lax
from jax.experimental import pallas as pl
from jax.experimental.pallas import tpu as pltpu

# dims match dinov2_vits14 / module defaults
FEAT_DIM = 384      # backbone.head.in_features for ViT-S/14
PROJ_HIDDEN = 512
PROJ_DIM = 128
CLS_HIDDEN = 256
PROB_PAD = 128      # lane-dense classify output width (column 0 carries the probability)

# Per-view batch tile.  Chosen so the worst case (two views, double-buffered bf16 token tiles at
# DINOv2's T=256) stays under the default scoped VMEM limit on all of v5e/v6e/v7x.
DEFAULT_TILE_B = 16
_POOL_CHUNK = 8     # sublane chunk for the f32 pooling accumulator


def _round_up(x, m):
    return -(-x // m) * m


def _pick_tile(batch, tile_b):
    # keep the tile a multiple of 8 sublanes so tiled (tile_b, 128/384) output blocks
    # satisfy the (8, 128) BlockSpec rule; small batches round up to a single 8-row tile.
    return max(8, _round_up(min(tile_b, batch), 8))


def _resident_spec(arr):
    """Full-array block with a constant index_map -> DMA'd once, VMEM-resident across grid."""
    nd = arr.ndim
    return pl.BlockSpec(arr.shape, lambda i, _nd=nd: (0,) * _nd)


def _pool_mean_f32(tok_ref, inv_t):
    """mean over the token axis, accumulated in f32 chunk-by-chunk (no full f32 token copy)."""
    tile_b, t_len, feat = tok_ref.shape
    n_full = t_len // _POOL_CHUNK
    rem = t_len - n_full * _POOL_CHUNK

    def body(c, acc):
        start = pl.multiple_of(c * _POOL_CHUNK, _POOL_CHUNK)
        chunk = tok_ref[:, pl.ds(start, _POOL_CHUNK), :].astype(jnp.float32)
        return acc + jnp.sum(chunk, axis=1)

    acc = jnp.zeros((tile_b, feat), jnp.float32)
    if n_full > 0:
        acc = lax.fori_loop(0, n_full, body, acc)
    if rem:
        tail = tok_ref[:, t_len - rem:, :].astype(jnp.float32)
        acc = acc + jnp.sum(tail, axis=1)
    return acc * inv_t


# ---------------------------------------------------------------------------
# Fused kernel factory: mean-pool -> ProjectionHead (Linear-ReLU-Linear-L2norm)
#                       [+ classify head], for 1 or 2 views per grid step.
# ---------------------------------------------------------------------------
def _make_fused_kernel(n_views, with_classify, inv_t):
    n_w = 6 if with_classify else 4

    def kernel(*refs):
        tok_refs = refs[:n_views]
        w_refs = refs[n_views:n_views + n_w]
        out_refs = refs[n_views + n_w:]
        z_refs = out_refs[:n_views]
        p_refs = out_refs[n_views:2 * n_views]
        prob_refs = out_refs[2 * n_views:] if with_classify else ()

        w1_ref, b1_ref, pw2_ref, pb2_ref = w_refs[:4]
        if with_classify:
            cw2_ref, cb2_ref = w_refs[4:6]

        tile_b = z_refs[0].shape[0]

        # ---- pooled = tokens.mean(dim=1), f32 accumulation ----
        pooled_views = [_pool_mean_f32(t, inv_t) for t in tok_refs]
        for v in range(n_views):
            p_refs[v][...] = pooled_views[v].astype(p_refs[v].dtype)

        # stack the views along M so the MXU sees one wider GEMM per weight
        pooled = pooled_views[0] if n_views == 1 else jnp.concatenate(pooled_views, axis=0)
        pooled_bf = pooled.astype(jnp.bfloat16)

        # ---- fused first layer: [proj.Linear | cls.Linear] -> ReLU ----
        h = jnp.dot(pooled_bf, w1_ref[...],
                    preferred_element_type=jnp.float32) + b1_ref[...]
        h = jnp.maximum(h, 0.0)

        # ---- projection head tail: Linear -> F.normalize(dim=1) ----
        z = jnp.dot(h[:, :PROJ_HIDDEN].astype(jnp.bfloat16), pw2_ref[...],
                    preferred_element_type=jnp.float32) + pb2_ref[...]
        sumsq = jnp.sum(z * z, axis=1, keepdims=True)
        z = z * lax.rsqrt(jnp.maximum(sumsq, 1e-24))   # z / max(||z||, 1e-12)

        # ---- classify head tail: VPU multiply + lane reduce + sigmoid ----
        if with_classify:
            ch = h[:, PROJ_HIDDEN:]                                   # (M, 256), lane-aligned slice
            logit = jnp.sum(ch * cw2_ref[...], axis=1, keepdims=True) + cb2_ref[...]
            prob = jax.nn.sigmoid(logit)                              # (M, 1)

        for v in range(n_views):
            z_refs[v][...] = z[v * tile_b:(v + 1) * tile_b].astype(z_refs[v].dtype)
            if with_classify:
                prob_refs[v][...] = jnp.broadcast_to(
                    prob[v * tile_b:(v + 1) * tile_b], prob_refs[v].shape
                ).astype(prob_refs[v].dtype)

    return kernel


def _fused_forward(params, token_views, *, with_classify, tile_b=DEFAULT_TILE_B):
    n_views = len(token_views)
    batch, t_len, feat = token_views[0].shape
    assert feat == FEAT_DIM

    tb = _pick_tile(batch, tile_b)
    pad = (-batch) % tb
    if pad:   # only pay the pad copy when batch is not already a tile multiple
        token_views = [jnp.pad(t, ((0, pad), (0, 0), (0, 0))) for t in token_views]
    bp = batch + pad
    grid = (bp // tb,)

    tok_spec = pl.BlockSpec((tb, t_len, feat), lambda i: (i, 0, 0))
    # If xprof shows the token DMA still exposed at small tiles, add
    # pipeline_mode=pl.Buffered(3) to tok_spec (costs one extra tile of VMEM per view).

    if with_classify:
        weights = (params["w1_fused"], params["b1_fused"],
                   params["proj_w2"], params["proj_b2"],
                   params["cls_w2"], params["cls_b2"])
    else:
        weights = (params["proj_w1"], params["proj_b1"],
                   params["proj_w2"], params["proj_b2"])

    out_shapes = ([jax.ShapeDtypeStruct((bp, PROJ_DIM), jnp.float32)] * n_views
                  + [jax.ShapeDtypeStruct((bp, FEAT_DIM), jnp.float32)] * n_views)
    out_specs = ([pl.BlockSpec((tb, PROJ_DIM), lambda i: (i, 0))] * n_views
                 + [pl.BlockSpec((tb, FEAT_DIM), lambda i: (i, 0))] * n_views)
    if with_classify:
        out_shapes += [jax.ShapeDtypeStruct((bp, PROB_PAD), jnp.float32)] * n_views
        out_specs += [pl.BlockSpec((tb, PROB_PAD), lambda i: (i, 0))] * n_views

    kernel = _make_fused_kernel(n_views, with_classify, 1.0 / t_len)

    outs = pl.pallas_call(
        kernel,
        grid=grid,
        out_shape=tuple(out_shapes),
        in_specs=[tok_spec] * n_views + [_resident_spec(w) for w in weights],
        out_specs=tuple(out_specs),
        compiler_params=pltpu.CompilerParams(dimension_semantics=("parallel",)),
    )(*token_views, *weights)

    z = [outs[v][:batch] for v in range(n_views)]
    p = [outs[n_views + v][:batch] for v in range(n_views)]
    if with_classify:
        probs = [outs[2 * n_views + v][:batch, 0] for v in range(n_views)]
        return z, p, probs
    return z, p


# ---------------------------------------------------------------------------
# OODModel.forward semantics (forward-only: classify head skipped entirely)
# ---------------------------------------------------------------------------
def ood_forward(params, tokens1, tokens2=None, tile_b=DEFAULT_TILE_B):
    if tokens2 is None:
        (z1,), (p1,) = _fused_forward(params, [tokens1], with_classify=False, tile_b=tile_b)
        return z1, p1
    (z1, z2), (p1, p2) = _fused_forward(params, [tokens1, tokens2],
                                        with_classify=False, tile_b=tile_b)
    return (z1, z2), (p1, p2)


def ood_forward_and_classify(params, tokens1, tokens2=None, tile_b=DEFAULT_TILE_B):
    """Returns (forward_output matching torch forward(), per-view classify probabilities)."""
    if tokens2 is None:
        (z1,), (p1,), (pr1,) = _fused_forward(params, [tokens1],
                                              with_classify=True, tile_b=tile_b)
        return (z1, p1), pr1
    (z1, z2), (p1, p2), (pr1, pr2) = _fused_forward(params, [tokens1, tokens2],
                                                    with_classify=True, tile_b=tile_b)
    return ((z1, z2), (p1, p2)), (pr1, pr2)


# ---------------------------------------------------------------------------
# Standalone classify (torch OODModel.classify on arbitrary pooled features)
# ---------------------------------------------------------------------------
def _classify_kernel(feat_ref, w1_ref, b1_ref, w2_ref, b2_ref, prob_ref):
    f = feat_ref[...].astype(jnp.bfloat16)                               # (B, F)
    h = jnp.dot(f, w1_ref[...],
                preferred_element_type=jnp.float32) + b1_ref[...]        # (B, 256)
    h = jnp.maximum(h, 0.0)
    logit = jnp.sum(h * w2_ref[...], axis=1, keepdims=True) + b2_ref[...]  # (B, 1) via VPU reduce
    prob = jax.nn.sigmoid(logit)
    prob_ref[...] = jnp.broadcast_to(prob, prob_ref.shape).astype(prob_ref.dtype)


def classify(params, features):
    # features are the tiny pooled (B, 384) vectors: whole-array-in-VMEM is fine here.
    batch = features.shape[0]
    vmem = pl.BlockSpec(memory_space=pltpu.MemorySpace.VMEM)
    prob_pad = pl.pallas_call(
        _classify_kernel,
        out_shape=jax.ShapeDtypeStruct((batch, PROB_PAD), jnp.float32),
        in_specs=[vmem] * 5,
        out_specs=vmem,
    )(features, params["cls_w1"], params["cls_b1"], params["cls_w2"], params["cls_b2"])
    return prob_pad[:, 0]     # torch .squeeze(1) as a free static slice


# ---------------------------------------------------------------------------
# Deterministic parameter init (shapes from OODModel.__init__)
# ---------------------------------------------------------------------------
def init_params(key):
    ks = jax.random.split(key, 8)

    def lin(kw, kb, fan_in, fan_out):
        bound = 1.0 / jnp.sqrt(float(fan_in))
        w = jax.random.uniform(kw, (fan_in, fan_out), jnp.float32, -bound, bound)
        b = jax.random.uniform(kb, (1, fan_out), jnp.float32, -bound, bound)
        return w, b

    proj_w1, proj_b1 = lin(ks[0], ks[1], FEAT_DIM, PROJ_HIDDEN)
    proj_w2, proj_b2 = lin(ks[2], ks[3], PROJ_HIDDEN, PROJ_DIM)
    cls_w1, cls_b1 = lin(ks[4], ks[5], FEAT_DIM, CLS_HIDDEN)
    cls_w2, cls_b2 = lin(ks[6], ks[7], CLS_HIDDEN, 1)

    proj_w1_bf = proj_w1.astype(jnp.bfloat16)
    cls_w1_bf = cls_w1.astype(jnp.bfloat16)
    return dict(
        # matmul weights in bf16 (halves weight DMA, native bf16 MXU); biases stay f32
        proj_w1=proj_w1_bf, proj_b1=proj_b1,
        proj_w2=proj_w2.astype(jnp.bfloat16), proj_b2=proj_b2,
        cls_w1=cls_w1_bf, cls_b1=cls_b1,
        cls_w2=cls_w2.T,          # (1, CLS_HIDDEN) row, f32, for the VPU multiply+reduce
        cls_b2=cls_b2,            # (1, 1) f32
        # pre-fused first layer: [proj.Linear | cls.Linear] as one (384, 768) GEMM
        w1_fused=jnp.concatenate([proj_w1_bf, cls_w1_bf], axis=1),
        b1_fused=jnp.concatenate([proj_b1, cls_b1], axis=1),
    )


# ---------------------------------------------------------------------------
# Pure-JAX reference (mirrors the kernel's bf16 casts) for correctness checks
# ---------------------------------------------------------------------------
def _reference(params, tokens):
    pooled = jnp.mean(tokens.astype(jnp.float32), axis=1)
    pbf = pooled.astype(jnp.bfloat16)
    h = jnp.dot(pbf, params["proj_w1"], preferred_element_type=jnp.float32) + params["proj_b1"]
    h = jnp.maximum(h, 0.0)
    z = jnp.dot(h.astype(jnp.bfloat16), params["proj_w2"],
                preferred_element_type=jnp.float32) + params["proj_b2"]
    z = z / jnp.maximum(jnp.linalg.norm(z, axis=1, keepdims=True), 1e-12)
    ch = jnp.dot(pbf, params["cls_w1"], preferred_element_type=jnp.float32) + params["cls_b1"]
    ch = jnp.maximum(ch, 0.0)
    prob = jax.nn.sigmoid(jnp.sum(ch * params["cls_w2"], axis=1) + params["cls_b2"][0, 0])
    return z, pooled, prob


if __name__ == "__main__":
    key = jax.random.PRNGKey(0)
    k_par, k_x1, k_x2 = jax.random.split(key, 3)

    params = init_params(k_par)

    B, T = 2, 16   # small batch, small number of patch tokens (DINOv2 would give T=256)
    # tokens come from the backbone; keep them bf16 so the DMA-bound kernel reads half the bytes
    tokens1 = jax.random.normal(k_x1, (B, T, FEAT_DIM), jnp.float32).astype(jnp.bfloat16)
    tokens2 = jax.random.normal(k_x2, (B, T, FEAT_DIM), jnp.float32).astype(jnp.bfloat16)

    # forward with x2 is None -> (z1, p1) (classify head skipped on this path)
    z1, p1 = ood_forward(params, tokens1)
    # forward with two views (one fused pallas_call, no host-side concat) + per-view probs
    ((z1b, z2), (p1b, p2)), (probs1, probs2) = ood_forward_and_classify(params, tokens1, tokens2)
    # standalone classify on pooled features -> (B,)
    probs_standalone = classify(params, p1)

    jax.block_until_ready((z1, p1, z1b, z2, p1b, p2, probs1, probs2, probs_standalone))

    assert z1.shape == (B, PROJ_DIM) and p1.shape == (B, FEAT_DIM)
    assert z2.shape == (B, PROJ_DIM) and p2.shape == (B, FEAT_DIM)
    assert probs1.shape == (B,) and probs2.shape == (B,) and probs_standalone.shape == (B,)
    # projected embeddings are L2-normalized along dim=1
    assert jnp.allclose(jnp.linalg.norm(z1, axis=1), 1.0, atol=1e-3)
    assert jnp.allclose(jnp.linalg.norm(z2, axis=1), 1.0, atol=1e-3)
    # forward-only and fused forward+classify paths agree
    assert jnp.allclose(z1, z1b, atol=2e-3)
    assert jnp.allclose(p1, p1b, atol=2e-3)
    # fused classify matches the standalone classify head
    assert jnp.allclose(probs1, probs_standalone, atol=2e-3)
    # pure-JAX reference (bf16 probabilities only match an f32 torch reference to ~1e-3)
    z_ref, p_ref, pr_ref = _reference(params, tokens1)
    assert jnp.allclose(z1, z_ref, atol=1e-2)
    assert jnp.allclose(p1, p_ref, atol=1e-2)
    assert jnp.allclose(probs1, pr_ref, atol=1e-2)

    print("KERNEL_OK")
</pallas_src>

<mosaic_0001>
module attributes {stable_mosaic.version = 11 : i64} {
  func.func @kernel(%arg0: i32, %arg1: memref<8x16x384xbf16, #tpu.memory_space<vmem>>, %arg2: memref<384x512xbf16, #tpu.memory_space<vmem>>, %arg3: memref<1x512xf32, #tpu.memory_space<vmem>>, %arg4: memref<512x128xbf16, #tpu.memory_space<vmem>>, %arg5: memref<1x128xf32, #tpu.memory_space<vmem>>, %arg6: memref<8x128xf32, #tpu.memory_space<vmem>>, %arg7: memref<8x384xf32, #tpu.memory_space<vmem>>) attributes {dimension_semantics = [#tpu.dimension_semantics<parallel>], iteration_bounds = array<i64: 1>, scalar_prefetch = 0 : i64, scratch_operands = 0 : i64, tpu.core_type = #tpu.core_type<tc>, window_params = [{transform_indices = @transform_0, window_bounds = array<i64: 8, 16, 384>}, {pipeline_mode = #tpu.pipeline_mode<synchronous>, transform_indices = @transform_1, window_bounds = array<i64: 384, 512>}, {pipeline_mode = #tpu.pipeline_mode<synchronous>, transform_indices = @transform_2, window_bounds = array<i64: 1, 512>}, {pipeline_mode = #tpu.pipeline_mode<synchronous>, transform_indices = @transform_3, window_bounds = array<i64: 512, 128>}, {pipeline_mode = #tpu.pipeline_mode<synchronous>, transform_indices = @transform_4, window_bounds = array<i64: 1, 128>}, {transform_indices = @transform_5, window_bounds = array<i64: 8, 128>}, {transform_indices = @transform_6, window_bounds = array<i64: 8, 384>}]} {
    %cst = arith.constant 0.000000e+00 : f32
    %0 = vector.broadcast %cst : f32 to vector<8x384xf32>
    %c0_i32 = arith.constant 0 : i32
    %c2_i32 = arith.constant 2 : i32
    %1 = arith.addi %c0_i32, %c2_i32 : i32
    %c1_i32 = arith.constant 1 : i32
    %2 = scf.for %arg8 = %c0_i32 to %1 step %c1_i32 iter_args(%arg9 = %0) -> (vector<8x384xf32>)  : i32 {
      %c8_i32 = arith.constant 8 : i32
      %29 = arith.muli %arg8, %c8_i32 : i32
      %30 = tpu.assume_multiple %29, 8 : i32
      %c0_18 = arith.constant 0 : index
      %31 = arith.index_cast %30 : i32 to index
      %c0_19 = arith.constant 0 : index
      %32 = vector.load %arg1[%c0_18, %31, %c0_19] : memref<8x16x384xbf16, #tpu.memory_space<vmem>>, vector<8x8x384xbf16>
      %33 = arith.extf %32 : vector<8x8x384xbf16> to vector<8x8x384xf32>
      %cst_20 = arith.constant dense<0.000000e+00> : vector<8x384xf32>
      %34 = vector.multi_reduction <add>, %33, %cst_20 [1] : vector<8x8x384xf32> to vector<8x384xf32>
      %35 = arith.addf %arg9, %34 : vector<8x384xf32>
      scf.yield %35 : vector<8x384xf32>
    }
    %c2_i32_0 = arith.constant 2 : i32
    %cst_1 = arith.constant 6.250000e-02 : f32
    %3 = vector.broadcast %cst_1 : f32 to vector<8x384xf32>
    %4 = arith.mulf %2, %3 : vector<8x384xf32>
    %c0 = arith.constant 0 : index
    %c0_2 = arith.constant 0 : index
    %5 = vector.load %arg7[%c0, %c0_2] : memref<8x384xf32, #tpu.memory_space<vmem>>, vector<8x384xf32>
    tpu.vector_store %arg7[%c0, %c0_2], %4 {strides = array<i32>} : memref<8x384xf32, #tpu.memory_space<vmem>>, vector<8x384xf32>,
    %6 = arith.truncf %4 : vector<8x384xf32> to vector<8x384xbf16>
    %c0_3 = arith.constant 0 : index
    %c0_4 = arith.constant 0 : index
    %7 = vector.load %arg2[%c0_3, %c0_4] : memref<384x512xbf16, #tpu.memory_space<vmem>>, vector<384x512xbf16>
    %cst_5 = arith.constant dense<0.000000e+00> : vector<8x512xf32>
    %8 = tpu.matmul %6, %7, %cst_5 {dimension_numbers = #tpu.dot_dimension_numbers<[1], [0], [0], [1], [0, 0, 1, 1], [], []>} : vector<8x384xbf16>, vector<384x512xbf16>, vector<8x512xf32> -> vector<8x512xf32>
    %c0_6 = arith.constant 0 : index
    %c0_7 = arith.constant 0 : index
    %9 = vector.load %arg3[%c0_6, %c0_7] : memref<1x512xf32, #tpu.memory_space<vmem>>, vector<1x512xf32>
    %10 = vector.broadcast %9 : vector<1x512xf32> to vector<8x512xf32>
    %11 = arith.addf %8, %10 : vector<8x512xf32>
    %cst_8 = arith.constant 0.000000e+00 : f32
    %12 = vector.broadcast %cst_8 : f32 to vector<8x512xf32>
    %13 = arith.maximumf %11, %12 : vector<8x512xf32>
    %14 = arith.truncf %13 : vector<8x512xf32> to vector<8x512xbf16>
    %c0_9 = arith.constant 0 : index
    %c0_10 = arith.constant 0 : index
    %15 = vector.load %arg4[%c0_9, %c0_10] : memref<512x128xbf16, #tpu.memory_space<vmem>>, vector<512x128xbf16>
    %cst_11 = arith.constant dense<0.000000e+00> : vector<8x128xf32>
    %16 = tpu.matmul %14, %15, %cst_11 {dimension_numbers = #tpu.dot_dimension_numbers<[1], [0], [0], [1], [0, 0, 1, 1], [], []>} : vector<8x512xbf16>, vector<512x128xbf16>, vector<8x128xf32> -> vector<8x128xf32>
    %c0_12 = arith.constant 0 : index
    %c0_13 = arith.constant 0 : index
    %17 = vector.load %arg5[%c0_12, %c0_13] : memref<1x128xf32, #tpu.memory_space<vmem>>, vector<1x128xf32>
    %18 = vector.broadcast %17 : vector<1x128xf32> to vector<8x128xf32>
    %19 = arith.addf %16, %18 : vector<8x128xf32>
    %20 = arith.mulf %19, %19 : vector<8x128xf32>
    %cst_14 = arith.constant dense<0.000000e+00> : vector<8xf32>
    %21 = vector.multi_reduction <add>, %20, %cst_14 [1] : vector<8x128xf32> to vector<8xf32>
    %22 = vector.shape_cast %21 : vector<8xf32> to vector<8x1xf32>
    %cst_15 = arith.constant 1.000000e-24 : f32
    %23 = vector.broadcast %cst_15 : f32 to vector<8x1xf32>
    %24 = arith.maximumf %22, %23 : vector<8x1xf32>
    %25 = math.rsqrt %24 : vector<8x1xf32>
    %26 = vector.broadcast %25 : vector<8x1xf32> to vector<8x128xf32>
    %27 = arith.mulf %19, %26 : vector<8x128xf32>
    %c0_16 = arith.constant 0 : index
    %c0_17 = arith.constant 0 : index
    %28 = vector.load %arg6[%c0_16, %c0_17] : memref<8x128xf32, #tpu.memory_space<vmem>>, vector<8x128xf32>
    tpu.vector_store %arg6[%c0_16, %c0_17], %27 {strides = array<i32>} : memref<8x128xf32, #tpu.memory_space<vmem>>, vector<8x128xf32>,
    return
  }
  func.func @transform_0(%arg0: i32) -> (i32, i32, i32) {
    %c0_i32 = arith.constant 0 : i32
    %c0_i32_0 = arith.constant 0 : i32
    %c0_i32_1 = arith.constant 0 : i32
    return %arg0, %c0_i32, %c0_i32_0 : i32, i32, i32
  }
  func.func @transform_1(%arg0: i32) -> (i32, i32) {
    %c0_i32 = arith.constant 0 : i32
    %c0_i32_0 = arith.constant 0 : i32
    %c0_i32_1 = arith.constant 0 : i32
    return %c0_i32, %c0_i32_0 : i32, i32
  }
  func.func @transform_2(%arg0: i32) -> (i32, i32) {
    %c0_i32 = arith.constant 0 : i32
    %c0_i32_0 = arith.constant 0 : i32
    %c0_i32_1 = arith.constant 0 : i32
    return %c0_i32, %c0_i32_0 : i32, i32
  }
  func.func @transform_3(%arg0: i32) -> (i32, i32) {
    %c0_i32 = arith.constant 0 : i32
    %c0_i32_0 = arith.constant 0 : i32
    %c0_i32_1 = arith.constant 0 : i32
    return %c0_i32, %c0_i32_0 : i32, i32
  }
  func.func @transform_4(%arg0: i32) -> (i32, i32) {
    %c0_i32 = arith.constant 0 : i32
    %c0_i32_0 = arith.constant 0 : i32
    %c0_i32_1 = arith.constant 0 : i32
    return %c0_i32, %c0_i32_0 : i32, i32
  }
  func.func @transform_5(%arg0: i32) -> (i32, i32) {
    %c0_i32 = arith.constant 0 : i32
    %c0_i32_0 = arith.constant 0 : i32
    return %arg0, %c0_i32 : i32, i32
  }
  func.func @transform_6(%arg0: i32) -> (i32, i32) {
    %c0_i32 = arith.constant 0 : i32
    %c0_i32_0 = arith.constant 0 : i32
    return %arg0, %c0_i32 : i32, i32
  }
}

</mosaic_0001>

<bundles_post_ra>
// kernel: tpu_custom_call.1
= control target key start
LH: loop header
LB: loop body
LE: loop exit
PB: predicated region body
PF: predicated region fallthrough
CT: control target
= control target key end

     0   :  { %12 = vsyncpa [#allocation3], 0  ;;  %s3298_s0 = inlined_call_operand.hbm [shape: bf16[8,16,384], index: 0, kind: input, shape index: {}]   ;;  %s3299_s1 = inlined_call_operand.hbm [shape: bf16[384,512], index: 1, kind: input, shape index: {}]   ;;  %s3300_s2 = inlined_call_operand.hbm [shape: f32[1,512], index: 2, kind: input, shape index: {}]   ;;  %s3301_s3 = inlined_call_operand.hbm [shape: bf16[512,128], index: 3, kind: input, shape index: {}]   ;;  %s3302_s4 = inlined_call_operand.vmem [shape: f32[1,128], index: 4, kind: input, shape index: {}]   ;;  %s3303_s5 = inlined_call_operand.hbm [shape: f32[8,128], index: 5, kind: output, shape index: {0}]   ;;  %s3304_s6 = inlined_call_operand.hbm [shape: f32[8,384], index: 6, kind: output, shape index: {1}]  }
   0x1   :  { %13 = vsyncpa [#allocation6], 0 }
   0x2   :  { %14 = vsyncpa [#allocation9], 0 }
   0x3   :  { %15 = vsyncpa [#allocation4], 0 }
   0x4   :  { %16 = vsyncpa [#allocation12], 0  ;;  %s2630_s21 = smov [#allocation5]  }
   0x5   :  { %s34_s22 = sshll.u32 %s2630_s21, 4  ;;  %s35_s22 = int_to_ptr.vmem [resolvable:$true] %s34_s22 }
   0x6   :  { %s2308_s23 = scalar_lea.vmem %s35_s22, 12288  ;;  %p2313_p1 = scmp.lt.s32.totalorder %s35_s22, %s35_s22 }
   0x7   :  { %p2309_p0 = scmp.ne.s32.totalorder %s35_s22, %s2308_s23  ;;  %p2314_p2 = scmp.lt.s32.totalorder %s2308_s23, %s2308_s23 }
   0x9   :  { %p2315_p3 = por %p2314_p2, %p2313_p1 }
   0xb   :  { %p2316_p4 = pnand %p2315_p3, %p2309_p0 }
   0xd   :  { %2319 = shalt.err (!%p2316_p4)
}
   0xe   :  { %s2631_s24 = smov 256   ;;  %s2632_s25 = smov 16  }
   0xf   :  { %40 = dma.hbm_to_vmem [thread:$0]  %s3299_s1, 12288, %s35_s22, [#allocation6], %s2631_s24, %s2631_s24, %s2632_s25  }
  0x10   :  { %s2633_s28 = smov [#allocation2]  }
  0x11   :  { %s22_s29 = sshll.u32 %s2633_s28, 4  ;;  %s23_s29 = int_to_ptr.vmem [resolvable:$true] %s22_s29 }
  0x12   :  { %s2328_s30 = scalar_lea.vmem %s23_s29, 3072  ;;  %p2333_p6 = scmp.lt.s32.totalorder %s23_s29, %s23_s29 }
  0x13   :  { %p2329_p5 = scmp.ne.s32.totalorder %s23_s29, %s2328_s30  ;;  %p2334_p7 = scmp.lt.s32.totalorder %s2328_s30, %s2328_s30 }
  0x15   :  { %p2335_p8 = por %p2334_p7, %p2333_p6 }
  0x17   :  { %p2336_p9 = pnand %p2335_p8, %p2329_p5 }
  0x19   :  { %2339 = shalt.err (!%p2336_p9)
}
  0x1a   :  { %s2634_s7 = smov 192   ;;  %s2635_s8 = smov 12  }
  0x1b   :  { %28 = dma.hbm_to_vmem [thread:$0]  %s3298_s0, 3072, %s23_s29, [#allocation3], %s2634_s7, %s2634_s7, %s2635_s8  }
  0x1c   :  { %s2636_s11 = smov [#allocation7]   ;;  %s2637_s13 = smov [#allocation8]  }
  0x1d   :  { %s47_s12 = sshll.u32 %s2636_s11, 4  ;;  %s56_s1 = sshll.u32 %s2637_s13, 4  ;;  %s48_s12 = int_to_ptr.vmem [resolvable:$true] %s47_s12  ;;  %s57_s1 = int_to_ptr.vmem [resolvable:$true] %s56_s1 }
  0x1e   :  { %s2348_s14 = scalar_lea.vmem %s48_s12, 64  ;;  %p2353_p11 = scmp.lt.s32.totalorder %s48_s12, %s48_s12 }
  0x1f   :  { %p2349_p10 = scmp.ne.s32.totalorder %s48_s12, %s2348_s14  ;;  %p2354_p12 = scmp.lt.s32.totalorder %s2348_s14, %s2348_s14 }
  0x21   :  { %p2355_p13 = por %p2354_p12, %p2353_p11 }
  0x23   :  { %p2356_p0 = pnand %p2355_p13, %p2349_p10 }
  0x25   :  { %2359 = shalt.err (!%p2356_p0)
}
  0x26   :  { %50 = dma.hbm_to_vmem [thread:$0]  %s3300_s2, 64, %s48_s12, [#allocation6]  }
  0x27   :  { %s2368_s17 = scalar_lea.vmem %s57_s1, 4096  ;;  %p2373_p2 = scmp.lt.s32.totalorder %s57_s1, %s57_s1 }
  0x28   :  { %p2369_p1 = scmp.ne.s32.totalorder %s57_s1, %s2368_s17  ;;  %p2374_p3 = scmp.lt.s32.totalorder %s2368_s17, %s2368_s17 }
  0x2a   :  { %p2375_p4 = por %p2374_p3, %p2373_p2 }
  0x2c   :  { %p2376_p5 = pnand %p2375_p4, %p2369_p1 }
  0x2e   :  { %2379 = shalt.err (!%p2376_p5)
}
  0x2f   :  { %s2638_s0 = smov 64   ;;  %s2639_s18 = smov 4  }
  0x30   :  { %62 = dma.hbm_to_vmem [thread:$0]  %s3301_s3, 4096, %s57_s1, [#allocation9], %s2638_s0, %s2638_s0, %s2639_s18  }
  0x31   :  { %2520 = dma.done.wait [#allocation3], 3072  }
  0x32   :  { %2521 = vsyncadd [#allocation3], 4294964224 }
  0x33   :  { %2522 = dma.done.wait [#allocation6], 12352  }
  0x34   :  { %2523 = vsyncadd [#allocation6], 4294954944 }
  0x35   :  { %2524 = dma.done.wait [#allocation9], 4096  }
  0x36   :  { %2525 = vsyncadd [#allocation9], 4294963200  ;;  %v2690_v0 = vmov 0.0   ;;  %v2692_v1 = vmov 0.0   ;;  %v2694_v2 = vmov 0.0   ;;  %v2696_v3 = vmov 0.0  }
  0x37   :  { %v2698_v4 = vmov 0.0   ;;  %v2700_v5 = vmov 0.0   ;;  %v2702_v6 = vmov 0.0   ;;  %v2704_v7 = vmov 0.0   ;;  %s2738_s2 = smov 0  }
  0x38   :  { %v2706_v8 = vmov 0.0   ;;  %v2708_v9 = vmov 0.0   ;;  %v2710_v10 = vmov 0.0   ;;  %v2712_v11 = vmov 0.0  }
  0x39   :  { %v2714_v12 = vmov 0.0   ;;  %v2716_v13 = vmov 0.0   ;;  %v2718_v14 = vmov 0.0   ;;  %v2720_v15 = vmov 0.0  }
  0x3a   :  { %v2722_v16 = vmov 0.0   ;;  %v2724_v17 = vmov 0.0   ;;  %v2726_v18 = vmov 0.0   ;;  %v2728_v19 = vmov 0.0  }
  0x3b   :  { %v2730_v20 = vmov 0.0   ;;  %v2732_v21 = vmov 0.0   ;;  %v2734_v22 = vmov 0.0   ;;  %v2736_v23 = vmov 0.0  }
  0x3c LB: > { %3305 = vst [vmem:[#allocation18_spill] sm:$0xff] %v2532_v0  ;;  %3306 = vst [vmem:[#allocation19_spill] sm:$0xff] %v2536_v1  ;;  %s1733_s3 = sshll.u32 %s2628_s2, 3  ;;  %s83_s2 = sadd.s32 1, %s2628_s2   ;;  %s2628_s2 = sphi %s2738_s2, %s83_s2   ;;  %v2624_v23 = vphi %v2736_v23, %v3404_v23   ;;  %v2620_v22 = vphi %v2734_v22, %v3403_v22   ;;  %v2616_v21 = vphi %v2732_v21, %v3402_v21   ;;  %v2612_v20 = vphi %v2730_v20, %v3401_v20   ;;  %v2608_v19 = vphi %v2728_v19, %v3400_v19   ;;  %v2604_v18 = vphi %v2726_v18, %v3399_v18   ;;  %v2600_v17 = vphi %v2724_v17, %v3398_v17   ;;  %v2596_v16 = vphi %v2722_v16, %v3397_v16   ;;  %v2592_v15 = vphi %v2720_v15, %v3396_v15   ;;  %v2588_v14 = vphi %v2718_v14, %v3395_v14   ;;  %v2584_v13 = vphi %v2716_v13, %v3394_v13   ;;  %v2580_v12 = vphi %v2714_v12, %v3393_v12   ;;  %v2576_v11 = vphi %v2712_v11, %v3392_v11   ;;  %v2572_v10 = vphi %v2710_v10, %v3391_v10   ;;  %v2568_v9 = vphi %v2708_v9, %v3390_v9   ;;  %v2564_v8 = vphi %v2706_v8, %v3389_v8   ;;  %v2560_v7 = vphi %v2704_v7, %v3388_v7   ;;  %v2556_v6 = vphi %v2702_v6, %v3387_v6   ;;  %v2552_v5 = vphi %v2700_v5, %v3386_v5   ;;  %v2548_v4 = vphi %v2698_v4, %v3385_v4   ;;  %v2544_v3 = vphi %v2696_v3, %v3384_v3   ;;  %v2540_v2 = vphi %v2694_v2, %v3383_v2   ;;  %v2536_v1 = vphi %v2692_v1, %v3382_v1   ;;  %v2532_v0 = vphi %v2690_v0, %v3381_v0  }
  0x3d   : > { %3307 = vst [vmem:[#allocation20_spill] sm:$0xff] %v2540_v2  ;;  %3308 = vst [vmem:[#allocation21_spill] sm:$0xff] %v2544_v3  ;;  %s109_s21 = sshra.s32 %s1733_s3, 3  ;;  %p3023_p6 = scmp.ge.s32.totalorder %s83_s2, 2  }
  0x3e   : > { %3309 = vst [vmem:[#allocation22_spill] sm:$0xff] %v2548_v4  ;;  %3310 = vst [vmem:[#allocation23_spill] sm:$0xff] %v2552_v5  ;;  %s1864_s22 = smul.u32 12, %s109_s21  ;;  %vm370_vm0 = vcmask (%p3023_p6), 1041409   ;;  %vm372_vm1 = vcmask (%p3023_p6), 1042434   ;;  %vm374_vm2 = vcmask (%p3023_p6), 1043459  }
  0x3f   : > { %3311 = vst [vmem:[#allocation24_spill] sm:$0xff] %v2556_v6  ;;  %3312 = vst [vmem:[#allocation25_spill] sm:$0xff] %v2560_v7  ;;  %vm376_vm3 = vcmask (%p3023_p6), 1044484   ;;  %vm378_vm4 = vcmask (%p3023_p6), 1045509   ;;  %vm380_vm5 = vcmask (%p3023_p6), 1046534   ;;  %vm382_vm6 = vcmask (%p3023_p6), 1047559  }
  0x40   : > { %3313 = vst [vmem:[#allocation26_spill] sm:$0xff] %v2564_v8  ;;  %3314 = vst [vmem:[#allocation27_spill] sm:$0xff] %v2568_v9  ;;  %s113_s23 = scalar_lea.vmem [#allocation2], %s1864_s22 }
  0x41   : > { %v114_v24 = vld [vmem:[%s113_s23] sm:$0xff]  ;;  %v116_v26 = vld [vmem:[%s113_s23 + $0x18] sm:$0xff]  ;;  %v118_v27 = vld [vmem:[%s113_s23 + $0x30] sm:$0xff] }
  0x42   : > { %v115_v25 = vld [vmem:[%s113_s23 + $0x8] ss:$24 sps:$4 sm:$0xff]   ;;  %v2816_v28 = vld [vmem:[%s113_s23 + $0x38] ss:$24 sps:$4 sm:$0xff]   ;;  %v130_v33 = vunpack.c.l.bf16 %v114_v24  ;;  %v131_v34 = vunpack.c.h.bf16 %v114_v24  ;;  %v133_v36 = vunpack.c.l.bf16 %v116_v26  ;;  %v134_v38 = vunpack.c.h.bf16 %v116_v26 }
  0x43   : > { %v2818_v29 = vld [vmem:[%s113_s23 + $0x48] sm:$0xff]  ;;  %v2820_v30 = vld [vmem:[%s113_s23 + $0x60] sm:$0xff]  ;;  %v2824_v32 = vld [vmem:[%s113_s23 + $0x78] sm:$0xff]  ;;  %v132_v35 = vunpack.c.l.bf16 %v115_v25  ;;  %v135_v39 = vunpack.c.h.bf16 %v115_v25  ;;  %v136_v40 = vunpack.c.l.bf16 %v118_v27  ;;  %v137_v41 = vunpack.c.h.bf16 %v118_v27 }
  0x44   : > { %v2822_v31 = vld [vmem:[%s113_s23 + $0x68] ss:$24 sps:$4 sm:$0xff]   ;;  %v2826_v37 = vld [vmem:[%s113_s23 + $0x90] sm:$0xff]  ;;  %v154_v60 = vrot.slane %v130_v33, 4  ;;  %v160_v61 = vrot.slane %v131_v34, 4  ;;  %v172_v63 = vrot.slane %v133_v36, 4 }
  0x45   : > { %v2828_v42 = vld [vmem:[%s113_s23 + $0x98] ss:$24 sps:$4 sm:$0xff]   ;;  %v2830_v43 = vld [vmem:[%s113_s23 + $0xa8] sm:$0xff]  ;;  %v166_v62 = vrot.slane %v132_v35, 4  ;;  %v178_v24 = vrot.slane %v134_v38, 4  ;;  %v184_v25 = vrot.slane %v135_v39, 4 }
  0x46   : > { %v190_v26 = vrot.slane %v136_v40, 4  ;;  %v196_v27 = vrot.slane %v137_v41, 4  ;;  %v155_v53 = vadd.f32 %v154_v60, %v130_v33  ;;  %v161_v54 = vadd.f32 %v160_v61, %v131_v34 }
  0x47   : > { %v167_v52 = vadd.f32 %v166_v62, %v132_v35  ;;  %v173_v55 = vadd.f32 %v172_v63, %v133_v36  ;;  %v179_v51 = vadd.f32 %v178_v24, %v134_v38  ;;  %v185_v56 = vadd.f32 %v184_v25, %v135_v39 }
  0x48   : > { %v191_v50 = vadd.f32 %v190_v26, %v136_v40  ;;  %v197_v57 = vadd.f32 %v196_v27, %v137_v41  ;;  %v156_v49 = vrot.slane %v155_v53, 2  ;;  %v162_v58 = vrot.slane %v161_v54, 2 }
  0x49   : > { %v168_v48 = vrot.slane %v167_v52, 2  ;;  %v174_v59 = vrot.slane %v173_v55, 2  ;;  %v180_v47 = vrot.slane %v179_v51, 2  ;;  %v186_v46 = vrot.slane %v185_v56, 2 }
  0x4a   : > { %v192_v45 = vrot.slane %v191_v50, 2  ;;  %v198_v44 = vrot.slane %v197_v57, 2  ;;  %v157_v0 = vadd.f32 %v156_v49, %v155_v53  ;;  %v163_v1 = vadd.f32 %v162_v58, %v161_v54 }
  0x4b   : > { %v169_v2 = vadd.f32 %v168_v48, %v167_v52  ;;  %v175_v3 = vadd.f32 %v174_v59, %v173_v55  ;;  %v181_v33 = vadd.f32 %v180_v47, %v179_v51  ;;  %v187_v34 = vadd.f32 %v186_v46, %v185_v56 }
  0x4c   : > { %v193_v35 = vadd.f32 %v192_v45, %v191_v50  ;;  %v199_v36 = vadd.f32 %v198_v44, %v197_v57  ;;  %v158_v38 = vrot.slane %v157_v0, 1  ;;  %v164_v39 = vrot.slane %v163_v1, 1 }
  0x4d   : > { %v170_v40 = vrot.slane %v169_v2, 1  ;;  %v176_v41 = vrot.slane %v175_v3, 1  ;;  %v182_v60 = vrot.slane %v181_v33, 1  ;;  %v188_v61 = vrot.slane %v187_v34, 1 }
  0x4e   : > { %v194_v62 = vrot.slane %v193_v35, 1  ;;  %v200_v63 = vrot.slane %v199_v36, 1  ;;  %v2848_v24 = vadd.f32 %v158_v38, %v157_v0  ;;  %v2850_v25 = vadd.f32 %v164_v39, %v163_v1 }
  0x4f   : > { %v2852_v49 = vadd.f32 %v170_v40, %v169_v2  ;;  %v2854_v48 = vadd.f32 %v176_v41, %v175_v3  ;;  %v2856_v47 = vadd.f32 %v182_v60, %v181_v33  ;;  %v2858_v45 = vadd.f32 %v188_v61, %v187_v34 }
  0x50   : > { %v2860_v44 = vadd.f32 %v194_v62, %v193_v35  ;;  %v2862_v46 = vadd.f32 %v200_v63, %v199_v36  ;;  %v3315_v50 = vunpack.c.l.bf16 %v2816_v28  ;;  %v3316_v0 = vunpack.c.l.bf16 %v2818_v29 }
  0x51   : > { %v3317_v1 = vunpack.c.h.bf16 %v2818_v29  ;;  %v3318_v3 = vunpack.c.h.bf16 %v2816_v28  ;;  %v3319_v54 = vunpack.c.l.bf16 %v2820_v30  ;;  %v3320_v56 = vunpack.c.h.bf16 %v2820_v30 }
  0x52   : > { %v202_v51 = vrot.slane %v3315_v50, 4  ;;  %v208_v52 = vrot.slane %v3316_v0, 4  ;;  %v3321_v58 = vunpack.c.l.bf16 %v2822_v31  ;;  %v3322_v26 = vunpack.c.l.bf16 %v2824_v32 }
  0x53   : > { %v214_v2 = vrot.slane %v3317_v1, 4  ;;  %v220_v53 = vrot.slane %v3318_v3, 4  ;;  %v226_v55 = vrot.slane %v3319_v54, 4  ;;  %v232_v57 = vrot.slane %v3320_v56, 4 }
  0x54   : > { %v238_v59 = vrot.slane %v3321_v58, 4  ;;  %v244_v27 = vrot.slane %v3322_v26, 4  ;;  %v3323_v33 = vmov %v3315_v50  ;;  %v3324_v35 = vmov %v3316_v0 }
  0x55   : > { %v203_v34 = vadd.f32 %v202_v51, %v3323_v33  ;;  %v209_v36 = vadd.f32 %v208_v52, %v3324_v35  ;;  %v3325_v38 = vmov %v3317_v1  ;;  %v3326_v40 = vmov %v3318_v3 }
  0x56   : > { %v215_v39 = vadd.f32 %v214_v2, %v3325_v38  ;;  %v221_v41 = vadd.f32 %v220_v53, %v3326_v40  ;;  %v3327_v60 = vmov %v3319_v54  ;;  %v3328_v62 = vmov %v3320_v56 }
  0x57   : > { %v227_v61 = vadd.f32 %v226_v55, %v3327_v60  ;;  %v233_v63 = vadd.f32 %v232_v57, %v3328_v62  ;;  %v3329_v50 = vmov %v3321_v58  ;;  %v3330_v51 = vmov %v3322_v26 }
  0x58   : > { %v239_v0 = vadd.f32 %v238_v59, %v3329_v50  ;;  %v245_v1 = vadd.f32 %v244_v27, %v3330_v51  ;;  %v204_v3 = vrot.slane %v203_v34, 2  ;;  %v210_v52 = vrot.slane %v209_v36, 2 }
  0x59   : > { %v216_v54 = vrot.slane %v215_v39, 2  ;;  %v222_v29 = vrot.slane %v221_v41, 2  ;;  %v228_v2 = vrot.slane %v227_v61, 2  ;;  %v234_v56 = vrot.slane %v233_v63, 2 }
  0x5a   : > { %v240_v28 = vrot.slane %v239_v0, 2  ;;  %v246_v53 = vrot.slane %v245_v1, 2  ;;  %v205_v58 = vadd.f32 %v204_v3, %v203_v34  ;;  %v211_v26 = vadd.f32 %v210_v52, %v209_v36 }
  0x5b   : > { %v217_v55 = vadd.f32 %v216_v54, %v215_v39  ;;  %v223_v33 = vadd.f32 %v222_v29, %v221_v41  ;;  %v229_v30 = vadd.f32 %v228_v2, %v227_v61  ;;  %v235_v57 = vadd.f32 %v234_v56, %v233_v63 }
  0x5c   : > { %v241_v35 = vadd.f32 %v240_v28, %v239_v0  ;;  %v247_v38 = vadd.f32 %v246_v53, %v245_v1  ;;  %v206_v59 = vrot.slane %v205_v58, 1  ;;  %v212_v40 = vrot.slane %v211_v26, 1 }
  0x5d   : > { %v218_v60 = vrot.slane %v217_v55, 1  ;;  %v224_v27 = vrot.slane %v223_v33, 1  ;;  %v230_v62 = vrot.slane %v229_v30, 1  ;;  %v236_v50 = vrot.slane %v235_v57, 1 }
  0x5e   : > { %v242_v51 = vrot.slane %v241_v35, 1  ;;  %v248_v4 = vrot.slane %v247_v38, 1  ;;  %v2896_v5 = vadd.f32 %v206_v59, %v205_v58  ;;  %v2898_v6 = vadd.f32 %v212_v40, %v211_v26 }
  0x5f   : > { %v2900_v34 = vadd.f32 %v218_v60, %v217_v55  ;;  %v2902_v36 = vadd.f32 %v224_v27, %v223_v33  ;;  %v2904_v39 = vadd.f32 %v230_v62, %v229_v30  ;;  %v2906_v41 = vadd.f32 %v236_v50, %v235_v57 }
  0x60   : > { %v2908_v61 = vadd.f32 %v242_v51, %v241_v35  ;;  %v2910_v63 = vadd.f32 %v248_v4, %v247_v38  ;;  %v3333_v0 = vunpack.c.h.bf16 %v2824_v32  ;;  %v3334_v3 = vunpack.c.h.bf16 %v2822_v31 }
  0x61   : > { %v3335_v54 = vunpack.c.l.bf16 %v2826_v37  ;;  %v3336_v2 = vunpack.c.h.bf16 %v2826_v37  ;;  %v3337_v28 = vunpack.c.l.bf16 %v2828_v42  ;;  %v3338_v58 = vunpack.c.l.bf16 %v2830_v43 }
  0x62   : > { %3331 = vst [vmem:[#allocation28_spill] sm:$0xff] %v2908_v61  ;;  %3332 = vst [vmem:[#allocation29_spill] sm:$0xff] %v2910_v63  ;;  %v250_v1 = vrot.slane %v3333_v0, 4  ;;  %v256_v52 = vrot.slane %v3334_v3, 4  ;;  %v3339_v4 = vunpack.c.h.bf16 %v2830_v43  ;;  %v3340_v33 = vunpack.c.h.bf16 %v2828_v42 }
  0x63   : > { %v262_v29 = vrot.slane %v3335_v54, 4  ;;  %v268_v56 = vrot.slane %v3336_v2, 4  ;;  %v274_v53 = vrot.slane %v3337_v28, 4  ;;  %v280_v26 = vrot.slane %v3338_v58, 4 }
  0x64   : > { %v286_v55 = vrot.slane %v3339_v4, 4  ;;  %v292_v30 = vrot.slane %v3340_v33, 4  ;;  %v3341_v57 = vmov %v3333_v0  ;;  %v3342_v38 = vmov %v3334_v3 }
  0x65   : > { %v251_v35 = vadd.f32 %v250_v1, %v3341_v57  ;;  %v257_v59 = vadd.f32 %v256_v52, %v3342_v38  ;;  %v3343_v40 = vmov %v3335_v54  ;;  %v3344_v27 = vmov %v3336_v2 }
  0x66   : > { %v263_v60 = vadd.f32 %v262_v29, %v3343_v40  ;;  %v269_v62 = vadd.f32 %v268_v56, %v3344_v27  ;;  %v3345_v50 = vmov %v3337_v28  ;;  %v3346_v0 = vmov %v3338_v58 }
  0x67   : > { %v275_v51 = vadd.f32 %v274_v53, %v3345_v50  ;;  %v281_v3 = vadd.f32 %v280_v26, %v3346_v0  ;;  %v3347_v54 = vmov %v3339_v4  ;;  %v3348_v32 = vmov %v3340_v33 }
  0x68   : > { %v287_v2 = vadd.f32 %v286_v55, %v3347_v54  ;;  %v293_v1 = vadd.f32 %v292_v30, %v3348_v32  ;;  %v252_v31 = vrot.slane %v251_v35, 2  ;;  %v258_v52 = vrot.slane %v257_v59, 2 }
  0x69   : > { %v264_v28 = vrot.slane %v263_v60, 2  ;;  %v270_v58 = vrot.slane %v269_v62, 2  ;;  %v276_v29 = vrot.slane %v275_v51, 2  ;;  %v282_v4 = vrot.slane %v281_v3, 2 }
  0x6a   : > { %v288_v37 = vrot.slane %v287_v2, 2  ;;  %v294_v56 = vrot.slane %v293_v1, 2  ;;  %v253_v33 = vadd.f32 %v252_v31, %v251_v35  ;;  %v259_v57 = vadd.f32 %v258_v52, %v257_v59 }
  0x6b   : > { %v265_v53 = vadd.f32 %v264_v28, %v263_v60  ;;  %v271_v38 = vadd.f32 %v270_v58, %v269_v62  ;;  %v277_v40 = vadd.f32 %v276_v29, %v275_v51  ;;  %v283_v26 = vadd.f32 %v282_v4, %v281_v3 }
  0x6c   : > { %v289_v27 = vadd.f32 %v288_v37, %v287_v2  ;;  %v295_v43 = vadd.f32 %v294_v56, %v293_v1  ;;  %v254_v55 = vrot.slane %v253_v33, 1  ;;  %v260_v50 = vrot.slane %v259_v57, 1 }
  0x6d   : > { %v266_v42 = vrot.slane %v265_v53, 1  ;;  %v272_v30 = vrot.slane %v271_v38, 1  ;;  %v278_v0 = vrot.slane %v277_v40, 1  ;;  %v284_v54 = vrot.slane %v283_v26, 1 }
  0x6e   : > { %v290_v32 = vrot.slane %v289_v27, 1  ;;  %v296_v7 = vrot.slane %v295_v43, 1  ;;  %v255_v8 = vadd.f32 %v254_v55, %v253_v33  ;;  %v261_v63 = vadd.f32 %v260_v50, %v259_v57  ;;  %v2127_v55 = vld [vmem:[#allocation5 + $0x2e0] ss:$16 sps:$4 sm:$0xff] (%p3023_p6)  }
  0x6f   : > { %v267_v9 = vadd.f32 %v266_v42, %v265_v53  ;;  %v273_v61 = vadd.f32 %v272_v30, %v271_v38  ;;  %v279_v35 = vadd.f32 %v278_v0, %v277_v40  ;;  %v285_v59 = vadd.f32 %v284_v54, %v283_v26  ;;  %v2128_v42 = vld [vmem:[#allocation5 + $0xc4] ss:$16 sps:$4 sm:$0xff] (%p3023_p6)   ;;  %v2138_v54 = vld [vmem:[#allocation5 + $0xa0] ss:$16 sps:$4 sm:$0xff] (%p3023_p6)  }
  0x70   : > { %v291_v60 = vadd.f32 %v290_v32, %v289_v27  ;;  %v297_v62 = vadd.f32 %v296_v7, %v295_v43  ;;  %v2946_v23 = vadd.f32 %v2624_v23, %v2848_v24   ;;  %v2950_v22 = vadd.f32 %v2620_v22, %v2850_v25   ;;  %v3360_v7 = vld [vmem:[#allocation27_spill] sm:$0xff] }
  0x71   : > { %v300_v52 = vadd.f32 %v2616_v21, %v2852_v49   ;;  %v2956_v20 = vadd.f32 %v2612_v20, %v2854_v48   ;;  %v2960_v19 = vadd.f32 %v2608_v19, %v2856_v47   ;;  %v303_v29 = vadd.f32 %v2604_v18, %v2858_v45   ;;  %v3376_v18 = vld [vmem:[#allocation19_spill] sm:$0xff] }
  0x72   : > { %v3349_v51 = vmov %v2946_v23  ;;  %v3350_v31 = vmov %v2950_v22  ;;  %v2966_v17 = vadd.f32 %v2600_v17, %v2860_v44   ;;  %v2970_v16 = vadd.f32 %v2596_v16, %v2862_v46   ;;  %v2126_v43 = vld [vmem:[#allocation5 + $0xe0] ss:$16 sps:$4 sm:$0xff] (%p3023_p6)  }
  0x73   : > { %v3351_v28 = vmov %v2956_v20  ;;  %v3352_v58 = vmov %v2960_v19  ;;  %v306_v49 = vadd.f32 %v2592_v15, %v2896_v5   ;;  %v2976_v14 = vadd.f32 %v2588_v14, %v2898_v6   ;;  %v3359_v5 = vld [vmem:[#allocation28_spill] sm:$0xff]  ;;  %v3361_v6 = vld [vmem:[#allocation29_spill] sm:$0xff] }
  0x74   : > { %v3353_v24 = vmov %v2966_v17  ;;  %v3354_v25 = vmov %v2970_v16  ;;  %v2980_v13 = vadd.f32 %v2584_v13, %v2900_v34   ;;  %v309_v45 = vadd.f32 %v2580_v12, %v2902_v36   ;;  %v3364_v16 = vld [vmem:[#allocation25_spill] sm:$0xff]  ;;  %v3368_v12 = vld [vmem:[#allocation23_spill] sm:$0xff]  ;;  %v3374_v17 = vld [vmem:[#allocation20_spill] sm:$0xff] }
  0x75   : > { %v3355_v48 = vmov %v2976_v14  ;;  %v2986_v11 = vadd.f32 %v2576_v11, %v2904_v39   ;;  %v2990_v10 = vadd.f32 %v2572_v10, %v2906_v41   ;;  %v312_v37 = vadd.f32 %v3360_v7, %v3359_v5   ;;  %v3362_v14 = vld [vmem:[#allocation26_spill] sm:$0xff]  ;;  %v2139_v32 = vld [vmem:[#allocation5 + $0x2a0] ss:$16 sps:$4 sm:$0xff] (%p3023_p6)  }
  0x76   : > { %v3356_v47 = vmov %v2980_v13  ;;  %v2996_v15 = vadd.f32 %v3362_v14, %v3361_v6   ;;  %v2999_v7 = vadd.f32 %v3364_v16, %v255_v8   ;;  %v3366_v13 = vld [vmem:[#allocation24_spill] sm:$0xff]  ;;  %v3005_v5 = vadd.f32 %v3368_v12, %v267_v9   ;;  %v3378_v8 = vld [vmem:[#allocation18_spill] sm:$0xff] }
  0x77   : > { %v3357_v44 = vmov %v2986_v11  ;;  %v3358_v46 = vmov %v2990_v10  ;;  %v3002_v6 = vadd.f32 %v3366_v13, %v261_v63   ;;  %v3370_v11 = vld [vmem:[#allocation22_spill] sm:$0xff]  ;;  %v3372_v10 = vld [vmem:[#allocation21_spill] sm:$0xff]  ;;  %v3014_v2 = vadd.f32 %v3374_v17, %v285_v59  }
  0x78   : > { %v3363_v56 = vmov %v2996_v15  ;;  %v3365_v34 = vmov %v2999_v7  ;;  %v3369_v39 = vmov %v3005_v5  ;;  %v3008_v4 = vadd.f32 %v3370_v11, %v273_v61   ;;  %v2124_v63 = vld [vmem:[#allocation5 + $0x2e4] ss:$16 sps:$4 sm:$0xff] (%p3023_p6)  }
  0x79   : > { %v3367_v36 = vmov %v3002_v6  ;;  %v3011_v3 = vadd.f32 %v3372_v10, %v279_v35   ;;  %v3375_v57 = vmov %v3014_v2  ;;  %v3017_v1 = vadd.f32 %v3376_v18, %v291_v60   ;;  %1142 = vmatprep.subr.bf16.mxu1 (%p3023_p6), %v2124_v63  ;;  %v2140_v35 = vld [vmem:[#allocation5 + $0x84] ss:$16 sps:$4 sm:$0xff] (%p3023_p6)  }
  0x7a   : > { %v3371_v41 = vmov %v3008_v4  ;;  %v3020_v0 = vadd.f32 %v3378_v8, %v297_v62   ;;  %v3383_v2 = vmov %v3375_v57  ;;  %v3386_v5 = vmov %v3369_v39  ;;  %1143 = vmatpush1.bf16.msra.mxu1 (%p3023_p6), %v2127_v55  ;;  %v2142_v62 = vld [vmem:[#allocation5 + $0x284] ss:$16 sps:$4 sm:$0xff] (%p3023_p6)  }
  0x7b   : > { %v3373_v33 = vmov %v3011_v3  ;;  %v3377_v53 = vmov %v3017_v1  ;;  %v3385_v4 = vmov %v3371_v41  ;;  %v3387_v6 = vmov %v3367_v36  ;;  %v2134_v2 = vld [vmem:[#allocation5 + $0xa4] ss:$16 sps:$4 sm:$0xff] (%p3023_p6)  }
  0x7c   : > { %v3379_v38 = vmov %v3020_v0  ;;  %v3382_v1 = vmov %v3377_v53  ;;  %v3384_v3 = vmov %v3373_v33  ;;  %v3388_v7 = vmov %v3365_v34 }
  0x7d   : > { %v3381_v0 = vmov %v3379_v38  ;;  %v3389_v8 = vmov %v3363_v56  ;;  %v3390_v9 = vmov %v312_v37  ;;  %v3391_v10 = vmov %v3358_v46  ;;  %82 = sbr.rel (!%p3023_p6) target bundleno = 60 (0x3c), region = 72  ;;  %v2144_v7 = vld [vmem:[#allocation5 + $0x80] ss:$16 sps:$4 sm:$0xff] (%p3023_p6)  }
  0x7e   : > { %v3392_v11 = vmov %v3357_v44  ;;  %v3393_v12 = vmov %v309_v45  ;;  %v3394_v13 = vmov %v3356_v47  ;;  %v3395_v14 = vmov %v3355_v48  ;;  %v2136_v0 = vld [vmem:[#allocation5 + $0x2a4] ss:$16 sps:$4 sm:$0xff] (%p3023_p6)  }
  0x7f   : > { %v3396_v15 = vmov %v306_v49  ;;  %v3397_v16 = vmov %v3354_v25  ;;  %v3398_v17 = vmov %v3353_v24  ;;  %v3399_v18 = vmov %v303_v29 }
  0x80   : > { %v3400_v19 = vmov %v3352_v58  ;;  %v3401_v20 = vmov %v3351_v28  ;;  %v3402_v21 = vmov %v300_v52  ;;  %v3403_v22 = vmov %v3350_v31  ;;  %v2145_v15 = vld [vmem:[#allocation5 + $0x280] ss:$16 sps:$4 sm:$0xff] (%p3023_p6)   ;;  %v2146_v16 = vld [vmem:[#allocation5 + $0x64] ss:$16 sps:$4 sm:$0xff] (%p3023_p6)  }
  0x81   : > { %v3404_v23 = vmov %v3349_v51  ;;  %v3098_v61 = vmul.f32 (%p3023_p6), 0.0625, %v300_v52  ;;  %v2640_v40 = vmov (%p3023_p6), 0   ;;  %v3101_v26 = vmul.f32 (%p3023_p6), 0.0625, %v303_v29  ;;  %v2130_v19 = vld [vmem:[#allocation5 + $0x2c4] ss:$16 sps:$4 sm:$0xff] (%p3023_p6)  }
  0x82   :  { %v2122_v23 = vld [vmem:[#allocation5 + $0xe4] ss:$16 sps:$4 sm:$0xff]   ;;  %1174 = vmatprep.mubr.bf16.mxu1 %v2640_v40  ;;  %v3103_v27 = vmul.f32 0.0625, %v306_v49  ;;  %v2132_v20 = vld [vmem:[#allocation5 + $0xc0] ss:$16 sps:$4 sm:$0xff]   ;;  %v3109_v21 = vmul.f32 0.0625, %v309_v45  ;;  %1144 = vmatprep.subr.bf16.mxu1 %v2130_v19 }
  0x83   :  { %1101 = vmatprep.subr.bf16.mxu0 %v2122_v23  ;;  %v406_v50 = vpack.c.bf16 %v3098_v61, %v3098_v61  ;;  %v409_v9 = vpack.c.bf16 %v3101_v26, %v3101_v26  ;;  %v2133_v22 = vld [vmem:[#allocation5 + $0x2c0] ss:$16 sps:$4 sm:$0xff]   ;;  %v3113_v1 = vmul.f32 0.0625, %v312_v37  ;;  %v3116_v59 = vmul.f32 0.0625, %v3367_v36 }
  0x84   :  { %1102 = vmatpush1.bf16.msra.mxu0 %v2126_v43  ;;  %v412_v3 = vpack.c.bf16 %v3103_v27, %v3103_v27  ;;  %1145 = vmatpush1.bf16.msra.mxu1 %v2133_v22  ;;  %v415_v60 = vpack.c.bf16 %v3109_v21, %v3109_v21  ;;  %v3121_v52 = vmul.f32 0.0625, %v3373_v33  ;;  %v3124_v29 = vmul.f32 0.0625, %v3379_v38  ;;  %v2151_v38 = vld [vmem:[#allocation5 + $0x260] ss:$16 sps:$4 sm:$0xff]  }
  0x85   :  { %1103 = vmatprep.subr.bf16.mxu0 %v2128_v42  ;;  %v572_v4 = vunpack.c.l.b16 %v406_v50  ;;  %v575_v30 = vunpack.c.l.b16 %v409_v9  ;;  %1146 = vmatprep.subr.bf16.mxu1 %v2136_v0  ;;  %v3128_v5 = vmul.f32 0.0625, %v3350_v31  ;;  %v418_v37 = vpack.c.bf16 %v3113_v1, %v3113_v1  ;;  %v2154_v42 = vld [vmem:[#allocation5 + $0x244] ss:$16 sps:$4 sm:$0xff]  }
  0x86   :  { %v578_v49 = vunpack.c.l.b16 %v412_v3  ;;  %v3133_v6 = vmul.f32 0.0625, %v3352_v58  ;;  %v3136_v14 = vmul.f32 0.0625, %v3354_v25  ;;  %v421_v13 = vpack.c.bf16 %v3116_v59, %v3116_v59  ;;  %v2148_v58 = vld [vmem:[#allocation5 + $0x264] ss:$16 sps:$4 sm:$0xff]  }
  0x87   :  { %v608_v45 = vsel %vm370_vm0, %v575_v30, %v572_v4  ;;  %v581_v36 = vunpack.c.l.b16 %v415_v60  ;;  %v3141_v31 = vmul.f32 0.0625, %v3356_v47  ;;  %v405_v12 = vpack.c.bf16 %v3128_v5, %v3128_v5  ;;  %v2156_v4 = vld [vmem:[#allocation5 + $0x40] ss:$16 sps:$4 sm:$0xff]  }
  0x88   :  { %1104 = vmatpush1.bf16.msra.mxu0 %v2132_v20  ;;  %1147 = vmatpush1.bf16.msra.mxu1 %v2139_v32  ;;  %v609_v25 = vsel %vm372_vm1, %v578_v49, %v608_v45  ;;  %v3147_v11 = vmul.f32 0.0625, %v3358_v46  ;;  %v3150_v10 = vmul.f32 0.0625, %v3365_v34  ;;  %v408_v33 = vpack.c.bf16 %v3133_v6, %v3133_v6  ;;  %v2150_v46 = vld [vmem:[#allocation5 + $0x60] ss:$16 sps:$4 sm:$0xff]   ;;  %v2160_v45 = vld [vmem:[#allocation5 + $0x224] ss:$16 sps:$4 sm:$0xff]  }
  0x89   :  { %1105 = vmatprep.subr.bf16.mxu0 %v2134_v2  ;;  %1148 = vmatprep.subr.bf16.mxu1 %v2142_v62  ;;  %v424_v47 = vpack.c.bf16 %v3121_v52, %v3121_v52  ;;  %v3157_v17 = vmul.f32 0.0625, %v3371_v41  ;;  %v3160_v18 = vmul.f32 0.0625, %v3377_v53  ;;  %v411_v8 = vpack.c.bf16 %v3136_v14, %v3136_v14  ;;  %v2152_v41 = vld [vmem:[#allocation5 + $0x44] ss:$16 sps:$4 sm:$0xff]   ;;  %v2157_v32 = vld [vmem:[#allocation5 + $0x240] ss:$16 sps:$4 sm:$0xff]  }
  0x8a   :  { %v584_v23 = vunpack.c.l.b16 %v418_v37  ;;  %v414_v34 = vpack.c.bf16 %v3141_v31, %v3141_v31  ;;  %v417_v63 = vpack.c.bf16 %v3147_v11, %v3147_v11  ;;  %v420_v43 = vpack.c.bf16 %v3150_v10, %v3150_v10 }
  0x8b   :  { %v610_v53 = vsel %vm374_vm2, %v581_v36, %v609_v25  ;;  %v423_v55 = vpack.c.bf16 %v3157_v17, %v3157_v17  ;;  %v571_v50 = vunpack.c.l.b16 %v405_v12  ;;  %v426_v9 = vpack.c.bf16 %v3160_v18, %v3160_v18  ;;  %v2162_v36 = vld [vmem:[#allocation5 + $0x20] ss:$16 sps:$4 sm:$0xff]   ;;  %v2164_v25 = vld [vmem:[#allocation5 + $0x4] ss:$16 sps:$4 sm:$0xff]  }
  0x8c   :  { %1106 = vmatpush1.bf16.msra.mxu0 %v2138_v54  ;;  %1149 = vmatpush1.bf16.msra.mxu1 %v2145_v15  ;;  %v574_v19 = vunpack.c.l.b16 %v408_v33  ;;  %v577_v20 = vunpack.c.l.b16 %v411_v8  ;;  %v580_v22 = vunpack.c.l.b16 %v414_v34  ;;  %v587_v3 = vunpack.c.l.b16 %v421_v13  ;;  %v2163_v12 = vld [vmem:[#allocation5 + $0x220] ss:$16 sps:$4 sm:$0xff]  }
  0x8d   :  { %1107 = vmatprep.subr.bf16.mxu0 %v2140_v35  ;;  %1150 = vmatprep.subr.bf16.mxu1 %v2148_v58  ;;  %v583_v2 = vunpack.c.l.b16 %v417_v63  ;;  %v611_v30 = vsel %vm376_vm3, %v584_v23, %v610_v53  ;;  %v586_v0 = vunpack.c.l.b16 %v420_v43  ;;  %v2158_v35 = vld [vmem:[#allocation5 + $0x24] ss:$16 sps:$4 sm:$0xff]   ;;  %v427_v60 = vpack.c.bf16 %v3124_v29, %v3124_v29  ;;  %v2168_v34 = vld [vmem:[#allocation5] ss:$16 sps:$4 sm:$0xff]   ;;  %v2174_v53 = vld [vmem:[#allocation5 + $0xec] ss:$16 sps:$4 sm:$0xff]  }
  0x8e   :  { %v601_v54 = vsel %vm370_vm0, %v574_v19, %v571_v50  ;;  %v589_v62 = vunpack.c.l.b16 %v423_v55  ;;  %v592_v37 = vunpack.c.l.b16 %v426_v9  ;;  %v2169_v63 = vld [vmem:[#allocation5 + $0x200] ss:$16 sps:$4 sm:$0xff]   ;;  %v2170_v43 = vld [vmem:[#allocation5 + $0x1e4] ss:$16 sps:$4 sm:$0xff]   ;;  %v3189_v55 = vmul.f32 0.0625, %v3349_v51 }
  0x8f   :  { %v602_v49 = vsel %vm372_vm1, %v577_v20, %v601_v54  ;;  %v593_v33 = vunpack.c.l.b16 %v427_v60  ;;  %v3192_v50 = vmul.f32 0.0625, %v3351_v28  ;;  %v2172_v9 = vld [vmem:[#allocation5 + $0xe8] ss:$16 sps:$4 sm:$0xff]   ;;  %v2175_v19 = vld [vmem:[#allocation5 + $0x1e0] ss:$16 sps:$4 sm:$0xff]  }
  0x90   :  { %1108 = vmatpush1.bf16.msra.mxu0 %v2144_v7  ;;  %1151 = vmatpush1.bf16.msra.mxu1 %v2151_v38  ;;  %v590_v7 = vunpack.c.l.b16 %v424_v47  ;;  %v603_v15 = vsel %vm374_vm2, %v580_v22, %v602_v49  ;;  %v2166_v47 = vld [vmem:[#allocation5 + $0x204] ss:$16 sps:$4 sm:$0xff]   ;;  %v2180_v22 = vld [vmem:[#allocation5 + $0xcc] ss:$16 sps:$4 sm:$0xff]   ;;  %v404_v51 = vpack.c.bf16 %v3189_v55, %v3189_v55  ;;  %v2184_v60 = vld [vmem:[#allocation5 + $0xa8] ss:$16 sps:$4 sm:$0xff]  }
  0x91   :  { %1109 = vmatprep.subr.bf16.mxu0 %v2146_v16  ;;  %1152 = vmatprep.subr.bf16.mxu1 %v2154_v42  ;;  %v612_v16 = vsel %vm378_vm4, %v587_v3, %v611_v30  ;;  %v604_v13 = vsel %vm376_vm3, %v583_v2, %v603_v15  ;;  %v2176_v20 = vld [vmem:[#allocation5 + $0x1c4] ss:$16 sps:$4 sm:$0xff]   ;;  %v3197_v3 = vmul.f32 0.0625, %v3353_v24  ;;  %v407_v28 = vpack.c.bf16 %v3192_v50, %v3192_v50  ;;  %v2178_v2 = vld [vmem:[#allocation5 + $0xc8] ss:$16 sps:$4 sm:$0xff]  }
  0x92   :  { %v605_v58 = vsel %vm378_vm4, %v586_v0, %v604_v13  ;;  %v2182_v30 = vld [vmem:[#allocation5 + $0x1a4] ss:$16 sps:$4 sm:$0xff]   ;;  %v3205_v0 = vmul.f32 0.0625, %v3355_v48  ;;  %v2186_v24 = vld [vmem:[#allocation5 + $0xac] ss:$16 sps:$4 sm:$0xff]   ;;  %v3210_v49 = vmul.f32 0.0625, %v3357_v44 }
  0x93   :  { %v606_v8 = vsel %vm380_vm5, %v589_v62, %v605_v58  ;;  %v410_v54 = vpack.c.bf16 %v3197_v3, %v3197_v3  ;;  %v2187_v62 = vld [vmem:[#allocation5 + $0x1a0] ss:$16 sps:$4 sm:$0xff]   ;;  %v3215_v15 = vmul.f32 0.0625, %v3363_v56  ;;  %v2190_v13 = vld [vmem:[#allocation5 + $0x88] ss:$16 sps:$4 sm:$0xff]  }
  0x94   :  { %1110 = vmatpush1.bf16.msra.mxu0 %v2150_v46  ;;  %1153 = vmatpush1.bf16.msra.mxu1 %v2157_v32  ;;  %v613_v46 = vsel %vm380_vm5, %v590_v7, %v612_v16  ;;  %v607_v38 = vsel %vm382_vm6, %v592_v37, %v606_v8  ;;  %v570_v32 = vunpack.c.l.b16 %v404_v51  ;;  %v413_v48 = vpack.c.bf16 %v3205_v0, %v3205_v0  ;;  %v2192_v7 = vld [vmem:[#allocation5 + $0x8c] ss:$16 sps:$4 sm:$0xff]  }
  0x95   :  { %1111 = vmatprep.subr.bf16.mxu0 %v2152_v41  ;;  %1154 = vmatprep.subr.bf16.mxu1 %v2160_v45  ;;  %v616_v23 = vpack.c.b16 %v607_v38, %v607_v38  ;;  %v614_v41 = vsel %vm382_vm6, %v593_v33, %v613_v46  ;;  %v2188_v45 = vld [vmem:[#allocation5 + $0x184] ss:$16 sps:$4 sm:$0xff]   ;;  %v576_v37 = vunpack.c.l.b16 %v410_v54  ;;  %v416_v44 = vpack.c.bf16 %v3210_v49, %v3210_v49  ;;  %v2199_v46 = vld [vmem:[#allocation5 + $0x160] ss:$16 sps:$4 sm:$0xff]   ;;  %v2216_v54 = vld [vmem:[#allocation5 + $0xc] ss:$16 sps:$4 sm:$0xff]  }
  0x96   :  { %v3194_v42 = vpack.c.b16 %v614_v41, %v614_v41  ;;  %v579_v58 = vunpack.c.l.b16 %v413_v48  ;;  %v3221_v33 = vmul.f32 0.0625, %v3369_v39  ;;  %v419_v8 = vpack.c.bf16 %v3215_v15, %v3215_v15  ;;  %v2204_v39 = vld [vmem:[#allocation5 + $0x4c] ss:$16 sps:$4 sm:$0xff]  }
  0x97   :  { %1133 = vmatprep.mubr.bf16.mxu0 %v616_v23  ;;  %v582_v38 = vunpack.c.l.b16 %v416_v44  ;;  %v2223_v48 = vld [vmem:[#allocation5 + $0x2ec] ss:$16 sps:$4 sm:$0xff]   ;;  %v2224_v44 = vld [vmem:[#allocation5 + $0x1c8] ss:$16 sps:$4 sm:$0xff]  }
  0x98   :  { %1112 = vmatpush1.bf16.msra.mxu0 %v2156_v4  ;;  %1155 = vmatpush1.bf16.msra.mxu1 %v2163_v12  ;;  %v2181_v4 = vld [vmem:[#allocation5 + $0x1c0] ss:$16 sps:$4 sm:$0xff]   ;;  %v2194_v12 = vld [vmem:[#allocation5 + $0x164] ss:$16 sps:$4 sm:$0xff]   ;;  %v585_v41 = vunpack.c.l.b16 %v419_v8  ;;  %v2233_v8 = vld [vmem:[#allocation5 + $0x2a8] ss:$16 sps:$4 sm:$0xff]  }
  0x99   :  { %1113 = vmatprep.subr.bf16.mxu0 %v2158_v35  ;;  %1156 = vmatprep.subr.bf16.mxu1 %v2166_v47  ;;  %v573_v35 = vunpack.c.l.b16 %v407_v28  ;;  %v2196_v47 = vld [vmem:[#allocation5 + $0x68] ss:$16 sps:$4 sm:$0xff]  }
  0x9b   :  { %v594_v16 = vsel %vm370_vm0, %v573_v35, %v570_v32  ;;  %v2214_v35 = vld [vmem:[#allocation5 + $0x8] ss:$16 sps:$4 sm:$0xff]  }
  0x9c   :  { %1114 = vmatpush1.bf16.msra.mxu0 %v2162_v36  ;;  %1157 = vmatpush1.bf16.msra.mxu1 %v2169_v63  ;;  %v2193_v36 = vld [vmem:[#allocation5 + $0x180] ss:$16 sps:$4 sm:$0xff]   ;;  %v595_v56 = vsel %vm372_vm1, %v576_v37, %v594_v16  ;;  %v2221_v37 = vld [vmem:[#allocation5 + $0x2e8] ss:$16 sps:$4 sm:$0xff]  }
  0x9d   :  { %1115 = vmatprep.subr.bf16.mxu0 %v2164_v25  ;;  %1183 = vmatprep.subr.bf16.mxu1 %v2174_v53  ;;  %v2198_v25 = vld [vmem:[#allocation5 + $0x6c] ss:$16 sps:$4 sm:$0xff]   ;;  %v596_v63 = vsel %vm374_vm2, %v579_v58, %v595_v56  ;;  %v2202_v53 = vld [vmem:[#allocation5 + $0x48] ss:$16 sps:$4 sm:$0xff]  }
  0x9e   :  { %v2232_v58 = vld [vmem:[#allocation5 + $0x1ac] ss:$16 sps:$4 sm:$0xff]   ;;  %v2230_v56 = vld [vmem:[#allocation5 + $0x1a8] ss:$16 sps:$4 sm:$0xff]  }
  0x9f   :  { %1175 = vmatmul.mubr.bf16.vlgmr.msra.gmra.mxu1 %v3194_v42 }
  0xa0   :  { %1116 = vmatpush1.bf16.msra.mxu0 %v2168_v34  ;;  %1184 = vmatpush1.bf16.msra.mxu1 %v2172_v9  ;;  %v3227_v34 = vmul.f32 0.0625, %v3375_v57  ;;  %v2205_v9 = vld [vmem:[#allocation5 + $0x140] ss:$16 sps:$4 sm:$0xff]  }
  0xa1   :  { %1117 = vmatprep.subr.bf16.mxu0 %v2170_v43  ;;  %1185 = vmatprep.subr.bf16.mxu1 %v2180_v22  ;;  %v422_v43 = vpack.c.bf16 %v3221_v33, %v3221_v33  ;;  %v2210_v22 = vld [vmem:[#allocation5 + $0x2c] ss:$16 sps:$4 sm:$0xff]  }
  0xa2   :  { %1215 = vmatprep.mubr.bf16.mxu1 %v616_v23  ;;  %v2200_v23 = vld [vmem:[#allocation5 + $0x144] ss:$16 sps:$4 sm:$0xff]   ;;  %v425_v57 = vpack.c.bf16 %v3227_v34, %v3227_v34 }
  0xa3   :  { %v588_v51 = vunpack.c.l.b16 %v422_v43  ;;  %v2242_v43 = vld [vmem:[#allocation5 + $0x168] ss:$16 sps:$4 sm:$0xff]  }
  0xa4   :  { %1118 = vmatpush2.bf16.msra.mxu0 %v2175_v19  ;;  %1186 = vmatpush1.bf16.msra.mxu1 %v2178_v2  ;;  %v597_v19 = vsel %vm376_vm3, %v582_v38, %v596_v63  ;;  %v2208_v2 = vld [vmem:[#allocation5 + $0x28] ss:$16 sps:$4 sm:$0xff]   ;;  %v2244_v63 = vld [vmem:[#allocation5 + $0x16c] ss:$16 sps:$4 sm:$0xff]  }
  0xa5   :  { %1119 = vmatprep.subr.bf16.mxu0 %v2176_v20  ;;  %1187 = vmatprep.subr.bf16.mxu1 %v2186_v24  ;;  %v2206_v20 = vld [vmem:[#allocation5 + $0x124] ss:$16 sps:$4 sm:$0xff]   ;;  %v598_v28 = vsel %vm378_vm4, %v585_v41, %v597_v19  ;;  %v591_v24 = vunpack.c.l.b16 %v425_v57  ;;  %v2236_v38 = vld [vmem:[#allocation5 + $0x188] ss:$16 sps:$4 sm:$0xff]   ;;  %v2259_v57 = vld [vmem:[#allocation5 + $0x22c] ss:$16 sps:$4 sm:$0xff]  }
  0xa6   :  { %v599_v32 = vsel %vm380_vm5, %v588_v51, %v598_v28  ;;  %v2245_v41 = vld [vmem:[#allocation5 + $0x268] ss:$16 sps:$4 sm:$0xff]   ;;  %v2262_v28 = vld [vmem:[#allocation5 + $0x10c] ss:$16 sps:$4 sm:$0xff]  }
  0xa7   :  { %v2251_v19 = vld [vmem:[#allocation5 + $0x248] ss:$16 sps:$4 sm:$0xff]  }
  0xa8   :  { %1120 = vmatpush2.bf16.msra.mxu0 %v2181_v4  ;;  %1188 = vmatpush1.bf16.msra.mxu1 %v2184_v60  ;;  %v2211_v4 = vld [vmem:[#allocation5 + $0x120] ss:$16 sps:$4 sm:$0xff]   ;;  %v2257_v51 = vld [vmem:[#allocation5 + $0x228] ss:$16 sps:$4 sm:$0xff]  }
  0xa9   :  { %1121 = vmatprep.subr.bf16.mxu0 %v2182_v30  ;;  %1189 = vmatprep.subr.bf16.mxu1 %v2192_v7  ;;  %v2212_v30 = vld [vmem:[#allocation5 + $0x104] ss:$16 sps:$4 sm:$0xff]   ;;  %v2217_v60 = vld [vmem:[#allocation5 + $0x100] ss:$16 sps:$4 sm:$0xff]   ;;  %v2218_v7 = vld [vmem:[#allocation5 + $0x1e8] ss:$16 sps:$4 sm:$0xff]  }
  0xac   :  { %1122 = vmatpush2.bf16.msra.mxu0 %v2187_v62  ;;  %1190 = vmatpush1.bf16.msra.mxu1 %v2190_v13  ;;  %v600_v62 = vsel %vm382_vm6, %v591_v24, %v599_v32  ;;  %v2226_v13 = vld [vmem:[#allocation5 + $0x1cc] ss:$16 sps:$4 sm:$0xff]   ;;  %v2268_v32 = vld [vmem:[#allocation8 + $0x70] sm:$0xff]  }
  0xad   :  { %1123 = vmatprep.subr.bf16.mxu0 %v2188_v45  ;;  %1191 = vmatprep.subr.bf16.mxu1 %v2198_v25  ;;  %v2220_v45 = vld [vmem:[#allocation5 + $0x1ec] ss:$16 sps:$4 sm:$0xff]   ;;  %v3238_v16 = vpack.c.b16 %v600_v62, %v600_v62 }
  0xae   :  { %v2235_v25 = vld [vmem:[#allocation5 + $0x2ac] ss:$16 sps:$4 sm:$0xff]  }
  0xaf   :  { %v2266_v24 = vld [vmem:[#allocation8 + $0x78] sm:$0xff]   ;;  %v2271_v62 = vld [vmem:[#allocation8 + $0x28] sm:$0xff]  }
  0xb0   :  { %1124 = vmatpush2.bf16.msra.mxu0 %v2193_v36  ;;  %1192 = vmatpush1.bf16.msra.mxu1 %v2196_v47  ;;  %v2229_v36 = vld [vmem:[#allocation5 + $0x2cc] ss:$16 sps:$4 sm:$0xff]  }
  0xb1   :  { %1125 = vmatprep.subr.bf16.mxu0 %v2194_v12  ;;  %1193 = vmatprep.subr.bf16.mxu1 %v2204_v39  ;;  %v2227_v12 = vld [vmem:[#allocation5 + $0x2c8] ss:$16 sps:$4 sm:$0xff]   ;;  %v2238_v47 = vld [vmem:[#allocation5 + $0x18c] ss:$16 sps:$4 sm:$0xff]  }
  0xb2   :  { %v2247_v39 = vld [vmem:[#allocation5 + $0x26c] ss:$16 sps:$4 sm:$0xff]  }
  0xb4   :  { %1126 = vmatpush2.bf16.msra.mxu0 %v2199_v46  ;;  %1194 = vmatpush1.bf16.msra.mxu1 %v2202_v53  ;;  %v2241_v46 = vld [vmem:[#allocation5 + $0x28c] ss:$16 sps:$4 sm:$0xff]  }
  0xb5   :  { %1127 = vmatprep.subr.bf16.mxu0 %v2200_v23  ;;  %1195 = vmatprep.subr.bf16.mxu1 %v2210_v22  ;;  %v2239_v23 = vld [vmem:[#allocation5 + $0x288] ss:$16 sps:$4 sm:$0xff]   ;;  %v2250_v53 = vld [vmem:[#allocation5 + $0x14c] ss:$16 sps:$4 sm:$0xff]  }
  0xb6   :  { %v2254_v22 = vld [vmem:[#allocation5 + $0x128] ss:$16 sps:$4 sm:$0xff]  }
  0xb8   :  { %1128 = vmatpush2.bf16.msra.mxu0 %v2205_v9  ;;  %1196 = vmatpush1.bf16.msra.mxu1 %v2208_v2  ;;  %v2253_v9 = vld [vmem:[#allocation5 + $0x24c] ss:$16 sps:$4 sm:$0xff]  }
  0xb9   :  { %1129 = vmatprep.subr.bf16.mxu0 %v2206_v20  ;;  %1197 = vmatprep.subr.bf16.mxu1 %v2216_v54  ;;  %v2256_v20 = vld [vmem:[#allocation5 + $0x12c] ss:$16 sps:$4 sm:$0xff]  }
  0xba   :  { %v2265_v2 = vld [vmem:[#allocation5 + $0x20c] ss:$16 sps:$4 sm:$0xff]  }
  0xbb   :  { %v2267_v54 = vld [vmem:[#allocation8 + $0x38] sm:$0xff]  }
  0xbc   :  { %1130 = vmatpush2.bf16.msra.mxu0 %v2211_v4  ;;  %1198 = vmatpush1.bf16.msra.mxu1 %v2214_v35  ;;  %v2260_v4 = vld [vmem:[#allocation5 + $0x108] ss:$16 sps:$4 sm:$0xff]  }
  0xbd   :  { %1131 = vmatprep.subr.bf16.mxu0 %v2212_v30  ;;  %1199 = vmatprep.subr.bf16.mxu1 %v2220_v45  ;;  %v2263_v30 = vld [vmem:[#allocation5 + $0x208] ss:$16 sps:$4 sm:$0xff]  }
  0xbe   :  { %v2269_v35 = vld [vmem:[#allocation8 + $0x30] sm:$0xff]   ;;  %v2272_v45 = vld [vmem:[#allocation8 + $0x60] sm:$0xff]  }
  0xc0   :  { %1132 = vmatpush2.bf16.msra.mxu0 %v2217_v60  ;;  %1200 = vmatpush2.bf16.msra.mxu1 %v2218_v7  ;;  %v2270_v60 = vld [vmem:[#allocation8 + $0x68] sm:$0xff]   ;;  %v2274_v7 = vld [vmem:[#allocation8 + $0x58] sm:$0xff]  }
  0xc1   :  { %1224 = vmatprep.subr.bf16.mxu0 %v2223_v48  ;;  %1201 = vmatprep.subr.bf16.mxu1 %v2226_v13  ;;  %v2273_v48 = vld [vmem:[#allocation8 + $0x20] sm:$0xff]   ;;  %v2278_v13 = vld [vmem:[#allocation8 + $0x48] sm:$0xff]  }
  0xc3   :  { %1134 = vmatmul.mubr.bf16.vlgmr.msra.gmra.mxu0 %v3238_v16 }
  0xc4   :  { %1225 = vmatpush1.bf16.msra.mxu0 %v2221_v37  ;;  %1256 = vmatprep.mubr.bf16.mxu0 %v2640_v40  ;;  %v2248_v40 = vld [vmem:[#allocation5 + $0x148] ss:$16 sps:$4 sm:$0xff]   ;;  %v2275_v37 = vld [vmem:[#allocation8 + $0x18] sm:$0xff]  }
  0xc5   :  { %1226 = vmatprep.subr.bf16.mxu0 %v2229_v36  ;;  %1202 = vmatpush2.bf16.msra.mxu1 %v2224_v44  ;;  %v2279_v36 = vld [vmem:[#allocation8 + $0x8] sm:$0xff]   ;;  %v2280_v44 = vld [vmem:[#allocation8 + $0x40] sm:$0xff]  }
  0xc6   :  { %1203 = vmatprep.subr.bf16.mxu1 %v2232_v58  ;;  %v2282_v58 = vld [vmem:[#allocation8 + $0xf8] sm:$0xff]  }
  0xc8   :  { %1227 = vmatpush1.bf16.msra.mxu0 %v2227_v12  ;;  %v2281_v12 = vld [vmem:[#allocation8] sm:$0xff]  }
  0xc9   :  { %1228 = vmatprep.subr.bf16.mxu0 %v2235_v25  ;;  %1204 = vmatpush2.bf16.msra.mxu1 %v2230_v56  ;;  %v2283_v25 = vld [vmem:[#allocation8 + $0xb8] sm:$0xff]   ;;  %v2284_v56 = vld [vmem:[#allocation8 + $0xf0] sm:$0xff]  }
  0xca   :  { %1205 = vmatprep.subr.bf16.mxu1 %v2238_v47  ;;  %v2286_v47 = vld [vmem:[#allocation8 + $0xe8] sm:$0xff]  }
  0xcc   :  { %1229 = vmatpush1.bf16.msra.mxu0 %v2233_v8  ;;  %v2285_v8 = vld [vmem:[#allocation8 + $0xb0] sm:$0xff]  }
  0xcd   :  { %1230 = vmatprep.subr.bf16.mxu0 %v2241_v46  ;;  %1206 = vmatpush2.bf16.msra.mxu1 %v2236_v38  ;;  %v2287_v46 = vld [vmem:[#allocation8 + $0xa8] sm:$0xff]   ;;  %v2288_v38 = vld [vmem:[#allocation8 + $0xe0] sm:$0xff]  }
  0xce   :  { %1207 = vmatprep.subr.bf16.mxu1 %v2244_v63  ;;  %v2290_v63 = vld [vmem:[#allocation8 + $0xd8] sm:$0xff]  }
  0xd0   :  { %1231 = vmatpush1.bf16.msra.mxu0 %v2239_v23  ;;  %v2289_v23 = vld [vmem:[#allocation8 + $0xa0] sm:$0xff]  }
  0xd1   :  { %1232 = vmatprep.subr.bf16.mxu0 %v2247_v39  ;;  %1208 = vmatpush2.bf16.msra.mxu1 %v2242_v43  ;;  %v2291_v39 = vld [vmem:[#allocation8 + $0x98] sm:$0xff]   ;;  %v2292_v43 = vld [vmem:[#allocation8 + $0xd0] sm:$0xff]  }
  0xd2   :  { %1209 = vmatprep.subr.bf16.mxu1 %v2250_v53  ;;  %v2294_v53 = vld [vmem:[#allocation8 + $0xc8] sm:$0xff]  }
  0xd4   :  { %1233 = vmatpush1.bf16.msra.mxu0 %v2245_v41  ;;  %v2293_v41 = vld [vmem:[#allocation8 + $0x90] sm:$0xff]  }
  0xd5   :  { %1234 = vmatprep.subr.bf16.mxu0 %v2253_v9  ;;  %1210 = vmatpush2.bf16.msra.mxu1 %v2248_v40  ;;  %v2295_v9 = vld [vmem:[#allocation8 + $0x88] sm:$0xff]   ;;  %v2296_v40 = vld [vmem:[#allocation8 + $0xc0] sm:$0xff]  }
  0xd6   :  { %1211 = vmatprep.subr.bf16.mxu1 %v2256_v20 }
  0xd8   :  { %1235 = vmatpush1.bf16.msra.mxu0 %v2251_v19  ;;  %v2297_v19 = vld [vmem:[#allocation8 + $0x80] sm:$0xff]  }
  0xd9   :  { %1236 = vmatprep.subr.bf16.mxu0 %v2259_v57  ;;  %1212 = vmatpush2.bf16.msra.mxu1 %v2254_v22 }
  0xda   :  { %1213 = vmatprep.subr.bf16.mxu1 %v2262_v28  ;;  %v526_v28 = vlaneseq }
  0xdc   :  { %1237 = vmatpush1.bf16.msra.mxu0 %v2257_v51 }
  0xdd   :  { %1238 = vmatprep.subr.bf16.mxu0 %v2265_v2  ;;  %1214 = vmatpush2.bf16.msra.mxu1 %v2260_v4  ;;  %v527_v2 = vshrl.u32 %v526_v28, 7 }
  0xde   :  { %1887 = vmatprep.subr.bf16.mxu1 %v2282_v58 }
  0xdf   :  { %v528_v4 = vsub.s32 0, %v527_v2  ;;  %v540_v58 = vsub.s32 3, %v527_v2 }
  0xe0   :  { %1239 = vmatpush1.bf16.msra.mxu0 %v2263_v30  ;;  %1216 = vmatmul.mubr.bf16.vlgmr.msra.gmra.mxu1 %v3238_v16  ;;  %v2277_v16 = vld [vmem:[#allocation8 + $0x10] sm:$0xff]   ;;  %v524_v30 = vld [vmem:[#allocation7] sm:$0xf] }
  0xe1   :  { %1865 = vmatprep.subr.bf16.mxu0 %v2266_v24  ;;  %1888 = vmatpush3.bf16.msra.mxu1 %v2283_v25  ;;  %v532_v24 = vsub.s32 1, %v527_v2 }
  0xe2   :  { %1889 = vmatprep.subr.bf16.mxu1 %v2284_v56  ;;  %v541_v56 = vrot.slane %v524_v30, %v540_v58 }
  0xe3   :  { %1257 = vmatmul.mubr.bf16.vlgmr.msra.gmra.mxu0 %v3194_v42  ;;  %v2276_v42 = vld [vmem:[#allocation8 + $0x50] sm:$0xff]  }
  0xe4   :  { %1866 = vmatpush3.bf16.msra.mxu0 %v2267_v54  ;;  %v529_v54 = vrot.slane %v524_v30, %v528_v4 }
  0xe5   :  { %1867 = vmatprep.subr.bf16.mxu0 %v2268_v32  ;;  %1890 = vmatpush3.bf16.msra.mxu1 %v2285_v8  ;;  %v533_v32 = vrot.slane %v524_v30, %v532_v24  ;;  %v1831_v24 = vld [vmem:[%s3302_s4] ss:$0 sm:$0xff]  ;;  %s2641_s4 = smov [#allocation11]  }
  0xe6   :  { %1891 = vmatprep.subr.bf16.mxu1 %v2286_v47  ;;  %s1639_s27 = sshll.u32 %s2641_s4, 4  ;;  %s1640_s27 = int_to_ptr.vmem [resolvable:$true] %s1639_s27 }
  0xe7   :  { %s2380_s28 = scalar_lea.vmem %s1640_s27, 384  ;;  %p2385_p8 = scmp.lt.s32.totalorder %s1640_s27, %s1640_s27 }
  0xe8   :  { %1868 = vmatpush3.bf16.msra.mxu0 %v2269_v35  ;;  %p2381_p7 = scmp.ne.s32.totalorder %s1640_s27, %s2380_s28  ;;  %p2386_p9 = scmp.lt.s32.totalorder %s2380_s28, %s2380_s28 }
  0xe9   :  { %1869 = vmatprep.subr.bf16.mxu0 %v2270_v60  ;;  %1892 = vmatpush3.bf16.msra.mxu1 %v2287_v46 }
  0xea   :  { %1893 = vmatprep.subr.bf16.mxu1 %v2288_v38  ;;  %p2387_p10 = por %p2386_p9, %p2385_p8 }
  0xec   :  { %1870 = vmatpush3.bf16.msra.mxu0 %v2271_v62  ;;  %p2388_p11 = pnand %p2387_p10, %p2381_p7 }
  0xed   :  { %1871 = vmatprep.subr.bf16.mxu0 %v2272_v45  ;;  %1894 = vmatpush3.bf16.msra.mxu1 %v2289_v23 }
  0xee   :  { %1895 = vmatprep.subr.bf16.mxu1 %v2290_v63 }
  0xf0   :  { %1872 = vmatpush3.bf16.msra.mxu0 %v2273_v48 }
  0xf1   :  { %1873 = vmatprep.subr.bf16.mxu0 %v2274_v7  ;;  %1896 = vmatpush3.bf16.msra.mxu1 %v2291_v39 }
  0xf2   :  { %1897 = vmatprep.subr.bf16.mxu1 %v2292_v43 }
  0xf4   :  { %1874 = vmatpush3.bf16.msra.mxu0 %v2275_v37 }
  0xf5   :  { %1875 = vmatprep.subr.bf16.mxu0 %v2276_v42  ;;  %1898 = vmatpush3.bf16.msra.mxu1 %v2293_v41 }
  0xf6   :  { %1899 = vmatprep.subr.bf16.mxu1 %v2294_v53 }
  0xf8   :  { %1876 = vmatpush3.bf16.msra.mxu0 %v2277_v16 }
  0xf9   :  { %1877 = vmatprep.subr.bf16.mxu0 %v2278_v13  ;;  %1900 = vmatpush3.bf16.msra.mxu1 %v2295_v9 }
  0xfa   :  { %1901 = vmatprep.subr.bf16.mxu1 %v2296_v40 }
  0xfc   :  { %1878 = vmatpush3.bf16.msra.mxu0 %v2279_v36 }
  0xfd   :  { %1879 = vmatprep.subr.bf16.mxu0 %v2280_v44  ;;  %1902 = vmatpush3.bf16.msra.mxu1 %v2297_v19 }
 0x100   :  { %1880 = vmatpush3.bf16.msra.mxu0 %v2281_v12  ;;  %v536_v12 = vsub.s32 2, %v527_v2 }
 0x102   :  { %v537_v25 = vrot.slane %v524_v30, %v536_v12 }
 0x15f   :  { %v1176_v20 = vpop.f32.mrf.mxu1 }
 0x161   :  { %v1178_v57 = vpop.f32.mrf.mxu1 }
 0x163   :  { %v1180_v22 = vpop.f32.mrf.mxu1 }
 0x165   :  { %v1181_v51 = vpop.f32.mrf.mxu1 }
 0x183   :  { %v1135_v35 = vpop.f32.mrf.mxu0 }
 0x184   :  { %v1136_v60 = vadd.f32 %v1135_v35, %v529_v54 }
 0x185   :  { %v1137_v62 = vpop.f32.mrf.mxu0 }
 0x186   :  { %v1177_v45 = vadd.f32 %v1176_v20, %v1136_v60  ;;  %v1138_v48 = vadd.f32 %v1137_v62, %v533_v32 }
 0x187   :  { %v1139_v7 = vpop.f32.mrf.mxu0 }
 0x188   :  { %v1179_v37 = vadd.f32 %v1178_v57, %v1138_v48  ;;  %v1265_v42 = vmax.f32 %v1177_v45, 0.0 }
 0x189   :  { %v1140_v16 = vpop.f32.mrf.mxu0 }
 0x18a   :  { %v1266_v13 = vmax.f32 %v1179_v37, 0.0  ;;  %v1269_v44 = vpack.c.bf16 %v1265_v42, %v1265_v42  ;;  %v371_v37 = vsel %vm370_vm0, %v3192_v50, %v3189_v55  ;;  %v384_v42 = vsel %vm370_vm0, %v3133_v6, %v3128_v5 }
 0x18b   :  { %v391_v16 = vsel %vm370_vm0, %v3101_v26, %v3098_v61 }
 0x18c   :  { %v1270_v36 = vpack.c.bf16 %v1266_v13, %v1266_v13  ;;  %v373_v13 = vsel %vm372_vm1, %v3197_v3, %v371_v37 }
 0x18d   :  { %v375_v55 = vsel %vm374_vm2, %v3205_v0, %v373_v13 }
 0x18e   :  { %1568 = vmatprep.mubr.bf16.mxu0 %v1270_v36  ;;  %v385_v36 = vsel %vm372_vm1, %v3136_v14, %v384_v42  ;;  %v377_v61 = vsel %vm376_vm3, %v3210_v49, %v375_v55 }
 0x18f   :  { %1569 = vmatmul.mubr.bf16.vlgmr.msra.gmra.mxu0 %v1269_v44  ;;  %v392_v44 = vsel %vm372_vm1, %v3103_v27, %v391_v16  ;;  %v386_v50 = vsel %vm374_vm2, %v3141_v31, %v385_v36  ;;  %v379_v27 = vsel %vm378_vm4, %v3215_v15, %v377_v61 }
 0x190   :  { %v393_v5 = vsel %vm374_vm2, %v3109_v21, %v392_v44  ;;  %v387_v26 = vsel %vm376_vm3, %v3147_v11, %v386_v50  ;;  %v381_v21 = vsel %vm380_vm5, %v3221_v33, %v379_v27 }
 0x191   :  { %v394_v6 = vsel %vm376_vm3, %v3113_v1, %v393_v5  ;;  %v388_v14 = vsel %vm378_vm4, %v3150_v10, %v387_v26  ;;  %v383_v1 = vsel %vm382_vm6, %v3227_v34, %v381_v21 }
 0x192   :  { %v395_v31 = vsel %vm378_vm4, %v3116_v59, %v394_v6  ;;  %v389_v3 = vsel %vm380_vm5, %v3157_v17, %v388_v14  ;;  %401 = vst [vmem:[#allocation11] sm:$0xff] %v383_v1 }
 0x193   :  { %v396_v11 = vsel %vm380_vm5, %v3121_v52, %v395_v31  ;;  %v390_v0 = vsel %vm382_vm6, %v3160_v18, %v389_v3 }
 0x194   :  { %v397_v10 = vsel %vm382_vm6, %v3124_v29, %v396_v11  ;;  %402 = vst [vmem:[#allocation11 + $0x8] sm:$0xff] %v390_v0 }
 0x195   :  { %403 = vst [vmem:[#allocation11 + $0x10] sm:$0xff] %v397_v10 }
 0x1a0   :  { %v1217_v8 = vpop.f32.mrf.mxu1 }
 0x1a1   :  { %v1218_v46 = vadd.f32 %v1217_v8, %v537_v25 }
 0x1a2   :  { %v1219_v38 = vpop.f32.mrf.mxu1 }
 0x1a3   :  { %v1258_v47 = vpop.f32.mrf.mxu0  ;;  %v1220_v39 = vadd.f32 %v1219_v38, %v541_v56 }
 0x1a4   :  { %v1259_v63 = vadd.f32 %v1258_v47, %v1218_v46  ;;  %v1221_v43 = vpop.f32.mrf.mxu1 }
 0x1a5   :  { %v1260_v23 = vpop.f32.mrf.mxu0 }
 0x1a6   :  { %v1261_v53 = vadd.f32 %v1260_v23, %v1220_v39  ;;  %v1267_v9 = vmax.f32 %v1259_v63, 0.0  ;;  %v1222_v40 = vpop.f32.mrf.mxu1 }
 0x1a7   :  { %v1262_v41 = vpop.f32.mrf.mxu0 }
 0x1a8   :  { %v1268_v20 = vmax.f32 %v1261_v53, 0.0  ;;  %v1271_v22 = vpack.c.bf16 %v1267_v9, %v1267_v9 }
 0x1a9   :  { %v1263_v19 = vpop.f32.mrf.mxu0 }
 0x1aa   :  { %v1272_v57 = vpack.c.bf16 %v1268_v20, %v1268_v20 }
 0x1ac   :  { %1608 = vmatprep.mubr.bf16.mxu1 %v1272_v57 }
 0x1ad   :  { %1609 = vmatmul.mubr.bf16.vlgmr.msra.gmra.mxu1 %v1271_v22 }
 0x24f   :  { %v1881_v51 = vpop.f32.mrf.mxu0 }
 0x251   :  { %v1882_v28 = vpop.f32.mrf.mxu0 }
 0x252   :  { %v1883_v30 = vadd.f32 %v1882_v28, %v1881_v51 }
 0x253   :  { %v1884_v2 = vpop.f32.mrf.mxu0 }
 0x254   :  { %v1571_v35 = vadd.f32 %v1883_v30, %v1831_v24 }
 0x255   :  { %v1885_v4 = vpop.f32.mrf.mxu0 }
 0x26d   :  { %v1903_v54 = vpop.f32.mrf.mxu1 }
 0x26f   :  { %v1904_v32 = vpop.f32.mrf.mxu1 }
 0x270   :  { %v1905_v60 = vadd.f32 %v1904_v32, %v1903_v54 }
 0x271   :  { %v1906_v62 = vpop.f32.mrf.mxu1 }
 0x272   :  { %v1611_v45 = vadd.f32 %v1905_v60, %v1571_v35 }
 0x273   :  { %v1907_v48 = vpop.f32.mrf.mxu1 }
 0x274   :  { %v1616_v7 = vmul.f32 %v1611_v45, %v1611_v45 }
 0x276   :  { %1617 = vadd.xlane.f32.xlu0 %v1616_v7 }
 0x277   :  { %2391 = shalt.err (!%p2388_p11)
}
 0x278   :  { %1642 = dma.vmem_to_hbm [thread:$0]  %s1640_s27, 384, %s3304_s6, [#allocation12]  }
 0x279   :  { %s2642_s7 = smov [#allocation10]  }
 0x27a   :  { %s1629_s8 = sshll.u32 %s2642_s7, 4  ;;  %s1630_s8 = int_to_ptr.vmem [resolvable:$true] %s1629_s8 }
 0x27b   :  { %s2400_s9 = scalar_lea.vmem %s1630_s8, 128  ;;  %p2405_p13 = scmp.lt.s32.totalorder %s1630_s8, %s1630_s8 }
 0x27c   :  { %p2401_p12 = scmp.ne.s32.totalorder %s1630_s8, %s2400_s9  ;;  %p2406_p0 = scmp.lt.s32.totalorder %s2400_s9, %s2400_s9 }
 0x27e   :  { %p2407_p1 = por %p2406_p0, %p2405_p13 }
 0x280   :  { %p2408_p2 = pnand %p2407_p1, %p2401_p12 }
 0x2ff   :  { %v1618_v59 = vpop.xlane.xlu0 %1617 }
 0x300   :  { %v1619_v52 = vmax.f32 %v1618_v59, 1e-24 }
 0x302   :  { %2298 = vrsqrt.f32 %v1619_v52 }
 0x30f   :  { %v2299_v29 = vpop.eup %2298 }
 0x310   :  { %v1621_v17 = vmul.f32 %v2299_v29, %v1611_v45 }
 0x312   :  { %1622 = vst [vmem:[#allocation10] sm:$0xff] %v1621_v17 }
 0x313   :  { %2411 = shalt.err (!%p2408_p2)
}
 0x314   :  { %1632 = dma.vmem_to_hbm [thread:$0]  %s1630_s8, 128, %s3303_s5, [#allocation4]  }
 0x315   :  { %2526 = dma.done.wait [#allocation4], 128  }
 0x316   :  { %2527 = vsyncadd [#allocation4], 4294967168 }
 0x317   :  { %2528 = dma.done.wait [#allocation12], 384  }
 0x318   :  { %2529 = vsyncadd [#allocation12], 4294966912 }
 0x319   :  { %1649 = vsyncpa [#allocation3], 1 }
 0x31a   :  { %1650 = vsyncpa [#allocation6], 1 }
 0x31b   :  { %1651 = vsyncpa [#allocation9], 1 }
 0x31c   :  { %1652 = vsyncpa [#allocation4], 1 }
 0x31d   :  { %1653 = vsyncpa [#allocation12], 1 }

</bundles_post_ra>
